<compile_context>
chip_gen: v7x
topology: tpu7x:2x2x1
jax: 0.10.0
libtpu: 0.0.40
codegen_flags: <defaults>
</compile_context>

<pallas_src>
import functools

import numpy as np
import jax
import jax.numpy as jnp
from jax import lax
from jax.experimental import pallas as pl
from jax.experimental.pallas import tpu as pltpu

EPS = 1e-5


def _round_up(x, m):
    return ((x + m - 1) // m) * m


# ----------------------------------------------------------------------------
# Pallas kernel: KxK conv as ONE im2col matmul per tile + bias + SiLU
# ----------------------------------------------------------------------------
def _dbb_conv_kernel(x_ref, w_ref, b_ref, o_ref, col_ref, *,
                     K, TH, W, Cin, Cout, KKC, Kc):
    # x_ref:   (1, Hp, Wp, Cin)  bf16 padded NHWC image of batch n.  Its index
    #                            map ignores h, so it stays resident in VMEM
    #                            across all h tiles of the same image.
    # w_ref:   (Kc, Coutp)       bf16 folded weight as one im2col matrix,
    #                            row index = kh*K*Cin + kw*Cin + c.
    # b_ref:   (1, Coutp)        f32 folded bias.
    # o_ref:   (TH*W, Cout)      f32 output rows of this (n, h) tile (exact
    #                            channel width -> no padded output slab).
    # col_ref: (TH, W, Kc)       bf16 VMEM im2col scratch; the lane dim holds
    #                            all K*K taps so the dot below is 128+ deep.
    h = pl.program_id(1)
    r0 = pl.multiple_of(h * TH, TH)          # first padded input row of tile

    # Lane-padding columns [KKC:Kc] meet zero weight rows, but they must be
    # finite: zero them at the first h tile so stale VMEM NaNs cannot leak in.
    # (h is an "arbitrary" axis, so every core starts its image at h == 0.)
    if KKC < Kc:
        @pl.when(h == 0)
        def _():
            col_ref[:, :, KKC:] = jnp.zeros((TH, W, Kc - KKC), col_ref.dtype)

    # Build the im2col LHS with K*K shifted copies.  Each copy is only Cin
    # lanes wide (lane-sparse when Cin << 128), but it moves TH*W*Cin bf16
    # elements — small next to the single 128-deep MXU matmul it feeds.
    for kh in range(K):
        rows = x_ref[0, pl.ds(r0 + kh, TH), :, :]            # (TH, Wp, Cin)
        for kw in range(K):
            t = kh * K + kw
            col_ref[:, :, t * Cin:(t + 1) * Cin] = rows[:, kw:kw + W, :]

    # One MXU pass: (TH*W, Kc) x (Kc, Coutp), f32 accumulation on the MXU
    # result path (no VALU accumulator read-modify-write).
    lhs = col_ref[...].reshape(TH * W, Kc)
    acc = jnp.dot(lhs, w_ref[...], preferred_element_type=jnp.float32)
    acc = acc + b_ref[...]
    # SiLU in f32; exp and approximate reciprocal both land on the EUP slot.
    y = acc * pl.reciprocal(1.0 + jnp.exp(-acc), approx=True)
    o_ref[...] = y[:, :Cout].astype(o_ref.dtype)


def _vmem_capacity_bytes():
    try:
        return int(pltpu.get_tpu_info().vmem_capacity_bytes)
    except Exception:
        return 64 << 20          # conservative fallback (v7x-sized)


def pallas_conv2d_bias_silu(x_nchw, kernel, bias, *, stride=1,
                            compute_dtype=jnp.bfloat16, target_pixels=2048):
    """'Same' KxK conv (groups=1, stride=1) + bias + SiLU as one Pallas kernel.

    HBM traffic = one read of the padded bf16 NHWC activation + one exact-width
    write of the output rows; the im2col expansion lives entirely in VMEM.
    """
    # TODO(synk): groups > 1 / stride > 1 paths of the module are not lowered.
    assert stride == 1
    N, Cin, H, W = x_nchw.shape
    Cout, Cin_k, K, K2 = kernel.shape
    assert K == K2 and Cin_k == Cin
    pad = K // 2
    # TODO(synk): general W needs a lane-padded W or masked last-column tile.
    assert W % 8 == 0, "demo path assumes W % 8 == 0 for aligned pixel tiles"

    TH = max(1, min(H, target_pixels // W))   # rows per tile (no divisor req.)
    HT = -(-H // TH)                          # ceil-div grid extent
    H_pad = HT * TH
    Hp, Wp = H_pad + 2 * pad, W + 2 * pad

    KKC = K * K * Cin
    Kc = _round_up(KKC, 128)                  # lane-dense contraction depth
    Coutp = _round_up(Cout, 128)              # MXU RHS width (result is sliced)

    # One fused layout pass: NCHW -> NHWC, zero pad (including bottom rows that
    # complete the last h tile), cast to the MXU operand dtype.
    # TODO(synk): accept NHWC bf16 activations / fold the halo + padding into
    # the kernel to avoid this extra HBM round trip for very large inputs.
    xp = jnp.pad(jnp.transpose(x_nchw, (0, 2, 3, 1)),
                 ((0, 0), (pad, pad + (H_pad - H)), (pad, pad), (0, 0)))
    xp = xp.astype(compute_dtype)

    # Folded weight as one (Kc, Coutp) im2col matrix; bias stays f32.
    wm = jnp.transpose(kernel, (2, 3, 1, 0)).reshape(KKC, Cout)
    wm = jnp.pad(wm, ((0, Kc - KKC), (0, Coutp - Cout))).astype(compute_dtype)
    bm = jnp.pad(bias, (0, Coutp - Cout)).reshape(1, Coutp).astype(jnp.float32)

    # VMEM budget (double-buffered pipeline blocks + scratch + dot result).
    # TODO(synk): for very large Hp*Wp*Cin images switch to a halo row-band DMA
    # path instead of keeping the whole padded image resident in VMEM.
    esz = np.dtype(compute_dtype).itemsize
    vmem_est = (2 * Hp * Wp * Cin * esz            # input image (x2 buffers)
                + 2 * Kc * Coutp * esz             # weight (x2 buffers)
                + 2 * Coutp * 4                    # bias
                + 2 * TH * W * Cout * 4            # output block (x2 buffers)
                + TH * W * Kc * esz                # im2col scratch
                + 3 * TH * W * Coutp * 4)          # dot result + epilogue temps
    vmem_limit = int(min(max(vmem_est + (8 << 20), 32 << 20),
                         int(0.85 * _vmem_capacity_bytes())))

    cost = pl.CostEstimate(
        flops=2 * N * H * W * KKC * Cout,
        transcendentals=N * H * W * Cout,
        bytes_accessed=int(x_nchw.size * x_nchw.dtype.itemsize
                           + Kc * Coutp * esz + Coutp * 4
                           + N * H * W * Cout * 4))

    kfn = functools.partial(_dbb_conv_kernel, K=K, TH=TH, W=W, Cin=Cin,
                            Cout=Cout, KKC=KKC, Kc=Kc)
    out = pl.pallas_call(
        kfn,
        out_shape=jax.ShapeDtypeStruct((N * H_pad * W, Cout), jnp.float32),
        grid=(N, HT),
        in_specs=[
            # Full padded image of batch n; the index map ignores h, so the
            # block stays resident in VMEM across all h tiles of the image.
            pl.BlockSpec((1, Hp, Wp, Cin), lambda n, h: (n, 0, 0, 0)),
            # TODO(synk): pipeline_mode=pl.Buffered(1) would single-buffer the
            # constant-index weight/bias blocks and save VMEM on v7x.
            pl.BlockSpec((Kc, Coutp), lambda n, h: (0, 0)),
            pl.BlockSpec((1, Coutp), lambda n, h: (0, 0)),
        ],
        out_specs=pl.BlockSpec((TH * W, Cout), lambda n, h: (n * HT + h, 0)),
        scratch_shapes=[pltpu.VMEM((TH, W, Kc), compute_dtype)],
        compiler_params=pltpu.CompilerParams(
            dimension_semantics=("parallel", "arbitrary"),
            vmem_limit_bytes=vmem_limit),
        cost_estimate=cost,
    )(xp, wm, bm)

    out = out.reshape(N, H_pad, W, Cout)[:, :H]
    return jnp.transpose(out, (0, 3, 1, 2))        # NCHW float32


# ----------------------------------------------------------------------------
# Parameter setup (deterministic synthetic init) — plain JAX "glue"
# ----------------------------------------------------------------------------
def init_bn(key, c):
    ks = jax.random.split(key, 4)
    return dict(
        gamma=jax.random.uniform(ks[0], (c,), minval=0.5, maxval=1.5),
        beta=0.1 * jax.random.normal(ks[1], (c,)),
        mean=0.1 * jax.random.normal(ks[2], (c,)),
        var=jax.random.uniform(ks[3], (c,), minval=0.5, maxval=1.5),
    )


def init_branchset(key, cin, cout, K, scale=0.2):
    """Params of the (dbb_1x1, dbb_avg, dbb_1x1_kxk) branch set.
    groups=1 < out_channels  =>  dbb_avg has conv+BNAndPad, 1x1_kxk uses
    IdentityBasedConv1x1 (internal_channels == in_channels)."""
    ks = jax.random.split(key, 9)
    return dict(
        w_1x1=scale * jax.random.normal(ks[0], (cout, cin, 1, 1)),
        bn_1x1=init_bn(ks[1], cout),
        w_avg=scale * jax.random.normal(ks[2], (cout, cin, 1, 1)),
        bn_avgpad=init_bn(ks[3], cout),          # BNAndPadLayer's BN
        bn_avgbn=init_bn(ks[4], cout),           # avgbn
        w_id=scale * jax.random.normal(ks[5], (cin, cin, 1, 1)),   # idconv1.conv.weight
        bn_kxk1=init_bn(ks[6], cin),             # BNAndPadLayer bn1
        w_kxk2=scale * jax.random.normal(ks[7], (cout, cin, K, K)),
        bn_kxk2=init_bn(ks[8], cout),
    )


def init_inner(key, cin, cout, K, scale=0.2):
    """Inner DiverseBranchBlockNOAct = branch set + its own dbb_origin conv_bn."""
    k0, k1, k2 = jax.random.split(key, 3)
    p = init_branchset(k0, cin, cout, K, scale)
    p['w_origin'] = scale * jax.random.normal(k1, (cout, cin, K, K))
    p['bn_origin'] = init_bn(k2, cout)
    return p


# ----------------------------------------------------------------------------
# Structural reparameterization (transI..transVI, groups=1) — plain JAX "glue"
# ----------------------------------------------------------------------------
def fuse_bn(kernel, bn):                                # transI_fusebn
    std = jnp.sqrt(bn['var'] + EPS)
    t = bn['gamma'] / std
    return kernel * t.reshape(-1, 1, 1, 1), bn['beta'] - bn['mean'] * t


def trans_1x1_kxk(k1, b1, k2, b2):                      # transIII (groups=1)
    k = jnp.einsum('omhw,mi->oihw', k2, k1[:, :, 0, 0])
    b = jnp.einsum('omhw,m->o', k2, b1) + b2
    return k, b


def trans_avg_kernel(c, K):                             # transV (groups=1)
    k = jnp.zeros((c, c, K, K), dtype=jnp.float32)
    return k.at[jnp.arange(c), jnp.arange(c), :, :].set(1.0 / (K * K))


def trans_multiscale(k, K):                             # transVI
    p = (K - k.shape[2]) // 2
    return jnp.pad(k, ((0, 0), (0, 0), (p, p), (p, p)))


def branchset_kernel_bias(p, cin, cout, K):
    # dbb_1x1
    k1, b1 = fuse_bn(p['w_1x1'], p['bn_1x1'])
    k1 = trans_multiscale(k1, K)
    # dbb_avg : 1x1 conv -> BN(+pad) -> avgpool -> BN
    ka1, ba1 = fuse_bn(p['w_avg'], p['bn_avgpad'])
    ka2, ba2 = fuse_bn(trans_avg_kernel(cout, K), p['bn_avgbn'])
    ka, ba = trans_1x1_kxk(ka1, ba1, ka2, ba2)
    # dbb_1x1_kxk : identity-based 1x1 -> BN(+pad) -> KxK conv -> BN
    kid = p['w_id'] + jnp.eye(cin, dtype=jnp.float32).reshape(cin, cin, 1, 1)
    kf, bf = fuse_bn(kid, p['bn_kxk1'])
    ks, bs = fuse_bn(p['w_kxk2'], p['bn_kxk2'])
    kk, bk = trans_1x1_kxk(kf, bf, ks, bs)
    return k1 + ka + kk, b1 + ba + bk                   # transII_addbranch


def full_equivalent_kernel_bias(inner_p, outer_p, cin, cout, K):
    k, b = fuse_bn(inner_p['w_origin'], inner_p['bn_origin'])   # inner dbb_origin
    kb, bb = branchset_kernel_bias(inner_p, cin, cout, K)       # inner branches
    ko, bo = branchset_kernel_bias(outer_p, cin, cout, K)       # outer branches
    return k + kb + ko, b + bb + bo


# ----------------------------------------------------------------------------
# Pure-JAX branch-by-branch reference (eval-mode forward) for verification
# ----------------------------------------------------------------------------
def conv_nchw(x, w, pad=0):
    return lax.conv_general_dilated(x, w, (1, 1), [(pad, pad), (pad, pad)],
                                    dimension_numbers=('NCHW', 'OIHW', 'NCHW'),
                                    precision=lax.Precision.HIGHEST)


def bn_eval(x, bn):
    std = jnp.sqrt(bn['var'] + EPS)
    return ((x - bn['mean'].reshape(1, -1, 1, 1)) / std.reshape(1, -1, 1, 1)
            * bn['gamma'].reshape(1, -1, 1, 1) + bn['beta'].reshape(1, -1, 1, 1))


def bn_zero_output(bn):   # BNAndPadLayer pad values
    std = jnp.sqrt(bn['var'] + EPS)
    return bn['beta'] - bn['mean'] * bn['gamma'] / std


def border_fill(xp, p, vals):
    N, C, Hp, Wp = xp.shape
    r = jnp.arange(Hp)[:, None]
    c = jnp.arange(Wp)[None, :]
    border = (r < p) | (r >= Hp - p) | (c < p) | (c >= Wp - p)
    return jnp.where(border[None, None, :, :], vals.reshape(1, C, 1, 1), xp)


def avg_pool(x, K):
    s = lax.reduce_window(x, 0.0, lax.add, (1, 1, K, K), (1, 1, 1, 1), 'VALID')
    return s / float(K * K)


def dbb_branches_forward(x, p, cin, cout, K, pad):
    # dbb_1x1
    out = bn_eval(conv_nchw(x, p['w_1x1']), p['bn_1x1'])
    # dbb_avg
    t = bn_eval(conv_nchw(x, p['w_avg']), p['bn_avgpad'])
    t = border_fill(jnp.pad(t, ((0, 0), (0, 0), (pad, pad), (pad, pad))),
                    pad, bn_zero_output(p['bn_avgpad']))
    t = bn_eval(avg_pool(t, K), p['bn_avgbn'])
    out = out + t
    # dbb_1x1_kxk
    kid = p['w_id'] + jnp.eye(cin, dtype=jnp.float32).reshape(cin, cin, 1, 1)
    u = bn_eval(conv_nchw(x, kid), p['bn_kxk1'])
    u = border_fill(jnp.pad(u, ((0, 0), (0, 0), (pad, pad), (pad, pad))),
                    pad, bn_zero_output(p['bn_kxk1']))
    u = bn_eval(conv_nchw(u, p['w_kxk2']), p['bn_kxk2'])
    return out + u


def reference_forward(x, inner_p, outer_p, cin, cout, K, pad):
    # inner DiverseBranchBlockNOAct
    o = bn_eval(conv_nchw(x, inner_p['w_origin'], pad), inner_p['bn_origin'])
    o = o + dbb_branches_forward(x, inner_p, cin, cout, K, pad)
    # outer DeepDiverseBranchBlock extra branches
    o = o + dbb_branches_forward(x, outer_p, cin, cout, K, pad)
    # nonlinear = SiLU
    return o * jax.nn.sigmoid(o)


# ----------------------------------------------------------------------------
if __name__ == "__main__":
    key = jax.random.PRNGKey(0)
    N, Cin, Cout, H, W, K = 2, 4, 8, 16, 16, 3
    pad = K // 2

    k_x, k_in, k_out = jax.random.split(key, 3)
    x = jax.random.normal(k_x, (N, Cin, H, W), dtype=jnp.float32)
    inner_p = init_inner(k_in, Cin, Cout, K)
    outer_p = init_branchset(k_out, Cin, Cout, K)

    # Fold all branches into a single KxK conv (parameter setup, plain JAX).
    kernel, bias = full_equivalent_kernel_bias(inner_p, outer_p, Cin, Cout, K)

    # Hot path in Pallas: KxK conv + bias + SiLU (bf16 MXU, f32 accumulate).
    fwd = jax.jit(pallas_conv2d_bias_silu)
    y = jax.block_until_ready(fwd(x, kernel, bias))

    # (1) Tight check of the kernel itself: same bf16-rounded operands,
    #     exact f32 conv + exact SiLU reference.
    x_bf = x.astype(jnp.bfloat16).astype(jnp.float32)
    k_bf = kernel.astype(jnp.bfloat16).astype(jnp.float32)
    y_fold = conv_nchw(x_bf, k_bf, pad=pad) + bias.reshape(1, -1, 1, 1)
    y_fold = y_fold * jax.nn.sigmoid(y_fold)
    err_fold = float(jnp.max(jnp.abs(y - y_fold)))
    assert err_fold < 6e-2, f"kernel vs folded-conv mismatch: {err_fold}"

    # (2) End-to-end check against the branch-by-branch eval-mode forward
    #     (f32); tolerance accounts for bf16 MXU operands.
    y_ref = reference_forward(x, inner_p, outer_p, Cin, Cout, K, pad)
    err = float(jnp.max(jnp.abs(y - y_ref)))
    assert err < 1.5e-1, f"mismatch vs branch-by-branch reference: {err}"

    print("KERNEL_OK")
</pallas_src>

<mosaic_0001>
module attributes {stable_mosaic.version = 11 : i64} {
  func.func @_dbb_conv_kernel(%arg0: i32, %arg1: i32, %arg2: memref<1x18x18x4xbf16, #tpu.memory_space<vmem>>, %arg3: memref<128x128xbf16, #tpu.memory_space<vmem>>, %arg4: memref<1x128xf32, #tpu.memory_space<vmem>>, %arg5: memref<256x8xf32, #tpu.memory_space<vmem>>, %arg6: memref<16x16x128xbf16, #tpu.memory_space<vmem>>) attributes {dimension_semantics = [#tpu.dimension_semantics<parallel>, #tpu.dimension_semantics<arbitrary>], iteration_bounds = array<i64: 2, 1>, scalar_prefetch = 0 : i64, scratch_operands = 1 : i64, tpu.core_type = #tpu.core_type<tc>, window_params = [{transform_indices = @transform_0, window_bounds = array<i64: 1, 18, 18, 4>}, {pipeline_mode = #tpu.pipeline_mode<synchronous>, transform_indices = @transform_1, window_bounds = array<i64: 128, 128>}, {pipeline_mode = #tpu.pipeline_mode<synchronous>, transform_indices = @transform_2, window_bounds = array<i64: 1, 128>}, {transform_indices = @transform_3, window_bounds = array<i64: 256, 8>}]} {
    %c16_i32 = arith.constant 16 : i32
    %0 = arith.muli %arg1, %c16_i32 : i32
    %1 = tpu.assume_multiple %0, 16 : i32
    %c0_i32 = arith.constant 0 : i32
    %2 = arith.cmpi eq, %arg1, %c0_i32 : i32
    %3 = arith.extui %2 : i1 to i32
    %c0_i32_0 = arith.constant 0 : i32
    %4 = arith.cmpi ne, %3, %c0_i32_0 : i32
    scf.if %4 {
      %cst_40 = arith.constant 0.000000e+00 : bf16
      %51 = vector.broadcast %cst_40 : bf16 to vector<16x16x92xbf16>
      %c0_41 = arith.constant 0 : index
      %c0_42 = arith.constant 0 : index
      %c36 = arith.constant 36 : index
      %52 = vector.load %arg6[%c0_41, %c0_42, %c36] : memref<16x16x128xbf16, #tpu.memory_space<vmem>>, vector<16x16x92xbf16>
      tpu.vector_store %arg6[%c0_41, %c0_42, %c36], %51 {strides = array<i32>} : memref<16x16x128xbf16, #tpu.memory_space<vmem>>, vector<16x16x92xbf16>,
    } else {
    }
    %c0_i32_1 = arith.constant 0 : i32
    %5 = arith.addi %1, %c0_i32_1 : i32
    %c0 = arith.constant 0 : index
    %6 = arith.index_cast %5 : i32 to index
    %c0_2 = arith.constant 0 : index
    %c0_3 = arith.constant 0 : index
    %7 = vector.load %arg2[%c0, %6, %c0_2, %c0_3] : memref<1x18x18x4xbf16, #tpu.memory_space<vmem>>, vector<1x16x18x4xbf16>
    %8 = vector.shape_cast %7 : vector<1x16x18x4xbf16> to vector<16x18x4xbf16>
    %9 = vector.extract_strided_slice %8 {offsets = [0, 0, 0], sizes = [16, 16, 4], strides = [1, 1, 1]} : vector<16x18x4xbf16> to vector<16x16x4xbf16>
    %c0_4 = arith.constant 0 : index
    %c0_5 = arith.constant 0 : index
    %c0_6 = arith.constant 0 : index
    %10 = vector.load %arg6[%c0_4, %c0_5, %c0_6] : memref<16x16x128xbf16, #tpu.memory_space<vmem>>, vector<16x16x4xbf16>
    tpu.vector_store %arg6[%c0_4, %c0_5, %c0_6], %9 {strides = array<i32>} : memref<16x16x128xbf16, #tpu.memory_space<vmem>>, vector<16x16x4xbf16>,
    %11 = vector.extract_strided_slice %8 {offsets = [0, 1, 0], sizes = [16, 16, 4], strides = [1, 1, 1]} : vector<16x18x4xbf16> to vector<16x16x4xbf16>
    %c0_7 = arith.constant 0 : index
    %c0_8 = arith.constant 0 : index
    %c4 = arith.constant 4 : index
    %12 = vector.load %arg6[%c0_7, %c0_8, %c4] : memref<16x16x128xbf16, #tpu.memory_space<vmem>>, vector<16x16x4xbf16>
    tpu.vector_store %arg6[%c0_7, %c0_8, %c4], %11 {strides = array<i32>} : memref<16x16x128xbf16, #tpu.memory_space<vmem>>, vector<16x16x4xbf16>,
    %13 = vector.extract_strided_slice %8 {offsets = [0, 2, 0], sizes = [16, 16, 4], strides = [1, 1, 1]} : vector<16x18x4xbf16> to vector<16x16x4xbf16>
    %c0_9 = arith.constant 0 : index
    %c0_10 = arith.constant 0 : index
    %c8 = arith.constant 8 : index
    %14 = vector.load %arg6[%c0_9, %c0_10, %c8] : memref<16x16x128xbf16, #tpu.memory_space<vmem>>, vector<16x16x4xbf16>
    tpu.vector_store %arg6[%c0_9, %c0_10, %c8], %13 {strides = array<i32>} : memref<16x16x128xbf16, #tpu.memory_space<vmem>>, vector<16x16x4xbf16>,
    %c1_i32 = arith.constant 1 : i32
    %15 = arith.addi %1, %c1_i32 : i32
    %c0_11 = arith.constant 0 : index
    %16 = arith.index_cast %15 : i32 to index
    %c0_12 = arith.constant 0 : index
    %c0_13 = arith.constant 0 : index
    %17 = vector.load %arg2[%c0_11, %16, %c0_12, %c0_13] : memref<1x18x18x4xbf16, #tpu.memory_space<vmem>>, vector<1x16x18x4xbf16>
    %18 = vector.shape_cast %17 : vector<1x16x18x4xbf16> to vector<16x18x4xbf16>
    %19 = vector.extract_strided_slice %18 {offsets = [0, 0, 0], sizes = [16, 16, 4], strides = [1, 1, 1]} : vector<16x18x4xbf16> to vector<16x16x4xbf16>
    %c0_14 = arith.constant 0 : index
    %c0_15 = arith.constant 0 : index
    %c12 = arith.constant 12 : index
    %20 = vector.load %arg6[%c0_14, %c0_15, %c12] : memref<16x16x128xbf16, #tpu.memory_space<vmem>>, vector<16x16x4xbf16>
    tpu.vector_store %arg6[%c0_14, %c0_15, %c12], %19 {strides = array<i32>} : memref<16x16x128xbf16, #tpu.memory_space<vmem>>, vector<16x16x4xbf16>,
    %21 = vector.extract_strided_slice %18 {offsets = [0, 1, 0], sizes = [16, 16, 4], strides = [1, 1, 1]} : vector<16x18x4xbf16> to vector<16x16x4xbf16>
    %c0_16 = arith.constant 0 : index
    %c0_17 = arith.constant 0 : index
    %c16 = arith.constant 16 : index
    %22 = vector.load %arg6[%c0_16, %c0_17, %c16] : memref<16x16x128xbf16, #tpu.memory_space<vmem>>, vector<16x16x4xbf16>
    tpu.vector_store %arg6[%c0_16, %c0_17, %c16], %21 {strides = array<i32>} : memref<16x16x128xbf16, #tpu.memory_space<vmem>>, vector<16x16x4xbf16>,
    %23 = vector.extract_strided_slice %18 {offsets = [0, 2, 0], sizes = [16, 16, 4], strides = [1, 1, 1]} : vector<16x18x4xbf16> to vector<16x16x4xbf16>
    %c0_18 = arith.constant 0 : index
    %c0_19 = arith.constant 0 : index
    %c20 = arith.constant 20 : index
    %24 = vector.load %arg6[%c0_18, %c0_19, %c20] : memref<16x16x128xbf16, #tpu.memory_space<vmem>>, vector<16x16x4xbf16>
    tpu.vector_store %arg6[%c0_18, %c0_19, %c20], %23 {strides = array<i32>} : memref<16x16x128xbf16, #tpu.memory_space<vmem>>, vector<16x16x4xbf16>,
    %c2_i32 = arith.constant 2 : i32
    %25 = arith.addi %1, %c2_i32 : i32
    %c0_20 = arith.constant 0 : index
    %26 = arith.index_cast %25 : i32 to index
    %c0_21 = arith.constant 0 : index
    %c0_22 = arith.constant 0 : index
    %27 = vector.load %arg2[%c0_20, %26, %c0_21, %c0_22] : memref<1x18x18x4xbf16, #tpu.memory_space<vmem>>, vector<1x16x18x4xbf16>
    %28 = vector.shape_cast %27 : vector<1x16x18x4xbf16> to vector<16x18x4xbf16>
    %29 = vector.extract_strided_slice %28 {offsets = [0, 0, 0], sizes = [16, 16, 4], strides = [1, 1, 1]} : vector<16x18x4xbf16> to vector<16x16x4xbf16>
    %c0_23 = arith.constant 0 : index
    %c0_24 = arith.constant 0 : index
    %c24 = arith.constant 24 : index
    %30 = vector.load %arg6[%c0_23, %c0_24, %c24] : memref<16x16x128xbf16, #tpu.memory_space<vmem>>, vector<16x16x4xbf16>
    tpu.vector_store %arg6[%c0_23, %c0_24, %c24], %29 {strides = array<i32>} : memref<16x16x128xbf16, #tpu.memory_space<vmem>>, vector<16x16x4xbf16>,
    %31 = vector.extract_strided_slice %28 {offsets = [0, 1, 0], sizes = [16, 16, 4], strides = [1, 1, 1]} : vector<16x18x4xbf16> to vector<16x16x4xbf16>
    %c0_25 = arith.constant 0 : index
    %c0_26 = arith.constant 0 : index
    %c28 = arith.constant 28 : index
    %32 = vector.load %arg6[%c0_25, %c0_26, %c28] : memref<16x16x128xbf16, #tpu.memory_space<vmem>>, vector<16x16x4xbf16>
    tpu.vector_store %arg6[%c0_25, %c0_26, %c28], %31 {strides = array<i32>} : memref<16x16x128xbf16, #tpu.memory_space<vmem>>, vector<16x16x4xbf16>,
    %33 = vector.extract_strided_slice %28 {offsets = [0, 2, 0], sizes = [16, 16, 4], strides = [1, 1, 1]} : vector<16x18x4xbf16> to vector<16x16x4xbf16>
    %c0_27 = arith.constant 0 : index
    %c0_28 = arith.constant 0 : index
    %c32 = arith.constant 32 : index
    %34 = vector.load %arg6[%c0_27, %c0_28, %c32] : memref<16x16x128xbf16, #tpu.memory_space<vmem>>, vector<16x16x4xbf16>
    tpu.vector_store %arg6[%c0_27, %c0_28, %c32], %33 {strides = array<i32>} : memref<16x16x128xbf16, #tpu.memory_space<vmem>>, vector<16x16x4xbf16>,
    %c0_29 = arith.constant 0 : index
    %c0_30 = arith.constant 0 : index
    %c0_31 = arith.constant 0 : index
    %35 = vector.load %arg6[%c0_29, %c0_30, %c0_31] : memref<16x16x128xbf16, #tpu.memory_space<vmem>>, vector<16x16x128xbf16>
    %36 = vector.shape_cast %35 : vector<16x16x128xbf16> to vector<256x128xbf16>
    %c0_32 = arith.constant 0 : index
    %c0_33 = arith.constant 0 : index
    %37 = vector.load %arg3[%c0_32, %c0_33] : memref<128x128xbf16, #tpu.memory_space<vmem>>, vector<128x128xbf16>
    %cst = arith.constant dense<0.000000e+00> : vector<256x128xf32>
    %38 = tpu.matmul %36, %37, %cst {dimension_numbers = #tpu.dot_dimension_numbers<[1], [0], [0], [1], [0, 0, 1, 1], [], []>} : vector<256x128xbf16>, vector<128x128xbf16>, vector<256x128xf32> -> vector<256x128xf32>
    %c0_34 = arith.constant 0 : index
    %c0_35 = arith.constant 0 : index
    %39 = vector.load %arg4[%c0_34, %c0_35] : memref<1x128xf32, #tpu.memory_space<vmem>>, vector<1x128xf32>
    %40 = vector.broadcast %39 : vector<1x128xf32> to vector<256x128xf32>
    %41 = arith.addf %38, %40 : vector<256x128xf32>
    %cst_36 = arith.constant 0.000000e+00 : f32
    %42 = vector.broadcast %cst_36 : f32 to vector<256x128xf32>
    %43 = arith.subf %42, %41 : vector<256x128xf32>
    %44 = math.exp %43 : vector<256x128xf32>
    %cst_37 = arith.constant 1.000000e+00 : f32
    %45 = vector.broadcast %cst_37 : f32 to vector<256x128xf32>
    %46 = arith.addf %45, %44 : vector<256x128xf32>
    %47 = tpu.reciprocal %46 {approx = true} : vector<256x128xf32> -> vector<256x128xf32>
    %48 = arith.mulf %41, %47 : vector<256x128xf32>
    %49 = vector.extract_strided_slice %48 {offsets = [0, 0], sizes = [256, 8], strides = [1, 1]} : vector<256x128xf32> to vector<256x8xf32>
    %c0_38 = arith.constant 0 : index
    %c0_39 = arith.constant 0 : index
    %50 = vector.load %arg5[%c0_38, %c0_39] : memref<256x8xf32, #tpu.memory_space<vmem>>, vector<256x8xf32>
    tpu.vector_store %arg5[%c0_38, %c0_39], %49 {strides = array<i32>} : memref<256x8xf32, #tpu.memory_space<vmem>>, vector<256x8xf32>,
    return
  }
  func.func @transform_0(%arg0: i32, %arg1: i32) -> (i32, i32, i32, i32) {
    %c0_i32 = arith.constant 0 : i32
    %c0_i32_0 = arith.constant 0 : i32
    %c0_i32_1 = arith.constant 0 : i32
    %c0_i32_2 = arith.constant 0 : i32
    return %arg0, %c0_i32, %c0_i32_0, %c0_i32_1 : i32, i32, i32, i32
  }
  func.func @transform_1(%arg0: i32, %arg1: i32) -> (i32, i32) {
    %c0_i32 = arith.constant 0 : i32
    %c0_i32_0 = arith.constant 0 : i32
    %c0_i32_1 = arith.constant 0 : i32
    return %c0_i32, %c0_i32_0 : i32, i32
  }
  func.func @transform_2(%arg0: i32, %arg1: i32) -> (i32, i32) {
    %c0_i32 = arith.constant 0 : i32
    %c0_i32_0 = arith.constant 0 : i32
    %c0_i32_1 = arith.constant 0 : i32
    return %c0_i32, %c0_i32_0 : i32, i32
  }
  func.func @transform_3(%arg0: i32, %arg1: i32) -> (i32, i32) {
    %c1_i32 = arith.constant 1 : i32
    %0 = arith.muli %arg0, %c1_i32 : i32
    %1 = arith.addi %0, %arg1 : i32
    %c0_i32 = arith.constant 0 : i32
    %c0_i32_0 = arith.constant 0 : i32
    return %1, %c0_i32 : i32, i32
  }
}

</mosaic_0001>

<bundles_post_ra>
// kernel: pallas_conv2d_bias_silu.1
= control target key start
LH: loop header
LB: loop body
LE: loop exit
PB: predicated region body
PF: predicated region fallthrough
CT: control target
= control target key end

     0   :  { %s3195_s12 = smov 0   ;;  %s3197_s13 = smov 0   ;;  %s4390_s0 = inlined_call_operand.vmem [shape: bf16[2,18,18,4], index: 0, kind: input, shape index: {}]   ;;  %s4391_s1 = inlined_call_operand.vmem [shape: bf16[128,128], index: 1, kind: input, shape index: {}]   ;;  %s4392_s2 = inlined_call_operand.vmem [shape: f32[1,128], index: 2, kind: input, shape index: {}]   ;;  %s4393_s3 = inlined_call_operand.vmem [shape: f32[512,8], index: 3, kind: output, shape index: {}]  }
   0x1   :  { %s3199_s14 = smov 0  }
   0x2 LB: > { %s25_s15 = sadd.s32 1, %s3160_s13  ;;  %p2581_p0 = scmp.ge.s32.totalorder %s3164_s14, 1  ;;  %s3164_s14 = sphi %s3199_s14, %s13_s14   ;;  %s3160_s13 = sphi %s3197_s13, %s4395_s13   ;;  %s3156_s12 = sphi %s3195_s12, %s4394_s12  }
   0x3   : > { %p27_p1 = scmp.ge.s32.totalorder %s25_s15, 2  ;;  %p151_p2 = scmp.lt.s32.totalorder %s3164_s14, 3 }
   0x5   : > { %s4397_s15 = smov (%p27_p1, %s25_s15), 0  ;;  %p152_p3 = pnand %p2581_p0, %p151_p2 }
   0x6   : > { %p176_p4 = scmp.lt.s32.totalorder (!%p152_p3), %s3156_s12, 1  ;;  %vm682_vm0 = vcmask (!%p152_p3), 1046528   ;;  %s3166_s21 = smov (!%p152_p3), 12   ;;  %vm424_vm1 = vsmask.f32 (!%p152_p3), 7424  ;;  %vm195_vm2 = vcmask (!%p152_p3), 1047840  }
   0x7   : > { %155 = sbr.rel (%p152_p3) target bundleno = 647 (0x287), region = 32  ;;  %s3167_s22 = smov (!%p152_p3), 8   ;;  %vm359_vm3 = vcmask (!%p152_p3), 31744   ;;  %vm665_vm4 = vcmask (!%p152_p3), 64544   ;;  %vm779_vm5 = vcmask (!%p152_p3), 97344   ;;  %vm976_vm6 = vcmask (!%p152_p3), 130144  }
   0x8   : > { %s3168_s23 = smov (!%p152_p3), 4   ;;  %s3169_s24 = smov (!%p152_p3), 16   ;;  %vm1281_vm7 = vcmask (!%p152_p3), 162944   ;;  %vm1394_vm8 = vcmask (!%p152_p3), 195744   ;;  %vm1591_vm9 = vcmask (!%p152_p3), 228544   ;;  %vm1896_vm10 = vcmask (!%p152_p3), 261344  }
   0x9   : > { %s3170_s25 = smov (!%p152_p3), 20   ;;  %s3171_s26 = smov (!%p152_p3), 24   ;;  %vm2009_vm11 = vcmask (!%p152_p3), 294144   ;;  %vm2466_vm12 = vcmask (!%p152_p3), 64512  }
   0xa   : > { %s3172_s27 = smov (!%p152_p3), 28   ;;  %s3173_s28 = smov (!%p152_p3), 32  }
   0xe   : > { %s177_s16 = scalar_select %p176_p4, %s3156_s12, 1 }
  0x10   : > { %s2876_s17 = smul.u32 216, %s177_s16 }
  0x12   : > { %s3220_s20 = scalar_lea.vmem %s4390_s0, %s2876_s17 }
  0x13   : > { %v3223_v0 = vld [vmem:[%s3220_s20 + $0x6c] sm:$0xff]   ;;  %v3233_v2 = vld [vmem:[%s3220_s20 + $0x60] sm:$0xff]   ;;  %v2913_v3 = vld [vmem:[%s3220_s20 + $0x68] ss:$0 sps:$4 sm:$0x11]  }
  0x14   : > { %v3226_v1 = vld [vmem:[%s3220_s20 + $0xc] sm:$0xff]   ;;  %944 = vrot.lane.b32.xlu1 %v3223_v0, %s3166_s21  ;;  %v3237_v4 = vld [vmem:[%s3220_s20] sm:$0xff]   ;;  %v1138_v5 = vshrl.u32 %v3223_v0, 16  ;;  %v707_v6 = vrot.slane %v3233_v2, 1  ;;  %v708_v7 = vrot.slane %v2913_v3, 1  ;;  %v3267_v36 = vld [vmem:[%s3220_s20 + $0x78] sm:$0xff]  }
  0x15   : > { %928 = vrot.lane.b32.xlu0 %v3226_v1, %s3166_s21  ;;  %v2915_v8 = vld [vmem:[%s3220_s20 + $0x8] ss:$0 sps:$4 sm:$0x11]   ;;  %v3243_v9 = vld [vmem:[%s3220_s20 + $0x6c] sm:$0xff]   ;;  %v683_v10 = vrot.slane %v3237_v4, 1  ;;  %v426_v22 = vshrl.u32 %v3237_v4, 16 }
  0x16   : > { %v3247_v11 = vld [vmem:[%s3220_s20 + $0xc] sm:$0xff]   ;;  %v709_v12 = vsel %vm682_vm0, %v707_v6, %v708_v7  ;;  %v684_v13 = vrot.slane %v2915_v8, 1  ;;  %v2917_v14 = vld [vmem:[%s3220_s20 + $0x74] ss:$0 sps:$4 sm:$0x11]   ;;  %v710_v15 = vrot.slane %v3243_v9, 1 }
  0x17   : > { %v686_v16 = vrot.slane %v3247_v11, 1  ;;  %v711_v18 = vrot.slane %v2917_v14, 1  ;;  %v2919_v19 = vld [vmem:[%s3220_s20 + $0x14] ss:$0 sps:$4 sm:$0x11]   ;;  %v438_v20 = vshrl.u32 %v3247_v11, 16 }
  0x18   : > { %747 = vrot.lane.b32.xlu1 %v709_v12, %s3167_s22  ;;  %v685_v17 = vsel %vm682_vm0, %v683_v10, %v684_v13  ;;  %v440_v21 = vshll.u32 %v3247_v11, 16  ;;  %v428_v23 = vshll.u32 %v3237_v4, 16  ;;  %v687_v25 = vrot.slane %v2919_v19, 1  ;;  %v2922_v44 = vld [vmem:[%s3220_s20 + $0x74] ss:$0 sps:$4 sm:$0x11]  }
  0x19   : > { %731 = vrot.lane.b32.xlu0 %v685_v17, %s3167_s22  ;;  %v712_v24 = vsel %vm682_vm0, %v710_v15, %v711_v18  ;;  %v445_v26 = vshll.u32 %v2919_v19, 16  ;;  %v433_v27 = vshll.u32 %v2915_v8, 16  ;;  %v534_v30 = vshrl.u32 %v3243_v9, 16  ;;  %v2923_v49 = vld [vmem:[%s3220_s20 + $0x14] ss:$0 sps:$4 sm:$0x11]  }
  0x1a   : > { %v442_v28 = vrot.slane %v440_v21, 1  ;;  %v430_v29 = vrot.slane %v428_v23, 1  ;;  %v536_v31 = vshll.u32 %v3243_v9, 16  ;;  %v688_v32 = vsel %vm682_vm0, %v686_v16, %v687_v25  ;;  %v3279_v52 = vld [vmem:[%s3220_s20 + $0x18] sm:$0xff]  }
  0x1b   : > { %v447_v33 = vrot.slane %v445_v26, 1  ;;  %v435_v34 = vrot.slane %v433_v27, 1  ;;  %v541_v35 = vshll.u32 %v2917_v14, 16  ;;  %v522_v40 = vshrl.u32 %v3233_v2, 16 }
  0x1c   : > { %749 = vrot.lane.b32.xlu1 %v712_v24, %s3167_s22  ;;  %v443_v37 = vor.u32 %v442_v28, %v438_v20  ;;  %v431_v38 = vor.u32 %v430_v29, %v426_v22  ;;  %v538_v39 = vrot.slane %v536_v31, 1  ;;  %v524_v42 = vshll.u32 %v3233_v2, 16  ;;  %v2924_v58 = vld [vmem:[%s3220_s20 + $0x80] ss:$0 sps:$4 sm:$0x11]  }
  0x1d   : > { %733 = vrot.lane.b32.xlu0 %v688_v32, %s3167_s22  ;;  %v543_v41 = vrot.slane %v541_v35, 1  ;;  %v529_v43 = vshll.u32 %v2913_v3, 16  ;;  %v1140_v48 = vshll.u32 %v3223_v0, 16  ;;  %v1145_v53 = vshll.u32 %v2922_v44, 16 }
  0x1e   : > { %v448_v45 = vsel %vm424_vm1, %v443_v37, %v447_v33  ;;  %v436_v46 = vsel %vm424_vm1, %v431_v38, %v435_v34  ;;  %v539_v47 = vor.u32 %v538_v39, %v534_v30  ;;  %v526_v50 = vrot.slane %v524_v42, 1  ;;  %v2925_v62 = vld [vmem:[%s3220_s20 + $0x20] ss:$0 sps:$4 sm:$0x11]   ;;  %v3309_v30 = vld [vmem:[%s3220_s20 + $0x78] sm:$0xff]   ;;  %v3324_v38 = vld [vmem:[%s3220_s20 + $0x84] sm:$0xff]  }
  0x1f   : > { %v531_v51 = vrot.slane %v529_v43, 1  ;;  %v1142_v55 = vrot.slane %v1140_v48, 1  ;;  %v1044_v56 = vshll.u32 %v3226_v1, 16  ;;  %v1049_v57 = vshll.u32 %v2923_v49, 16 }
  0x20   : > { %619 = vrot.lane.b32.xlu1 %v448_v45, %s3168_s23  ;;  %v544_v54 = vsel %vm424_vm1, %v539_v47, %v543_v41  ;;  %v527_v59 = vor.u32 %v526_v50, %v522_v40  ;;  %v1042_v60 = vshrl.u32 %v3226_v1, 16  ;;  %v1152_v61 = vshll.u32 %v3267_v36, 16  ;;  %v3321_v37 = vld [vmem:[%s3220_s20 + $0x80] ss:$0 sps:$4 sm:$0x11]   ;;  %v3329_v40 = vld [vmem:[%s3220_s20 + $0x24] sm:$0xff]  }
  0x21   : > { %617 = vrot.lane.b32.xlu0 %v436_v46, %s3168_s23  ;;  %v1147_v63 = vrot.slane %v1145_v53, 1  ;;  %v1046_v3 = vrot.slane %v1044_v56, 1  ;;  %v1051_v7 = vrot.slane %v1049_v57, 1  ;;  %v1150_v8 = vshrl.u32 %v3267_v36, 16 }
  0x22   : > { %v532_v6 = vsel %vm424_vm1, %v527_v59, %v531_v51  ;;  %v1056_v10 = vshll.u32 %v3279_v52, 16  ;;  %v1143_v12 = vor.u32 %v1142_v55, %v1138_v5  ;;  %v1154_v13 = vrot.slane %v1152_v61, 1  ;;  %v3343_v48 = vld [vmem:[%s3220_s20 + $0x8c] ss:$0 sps:$4 sm:$0x11]   ;;  %v3360_v59 = vld [vmem:[%s3220_s20 + $0x18] sm:$0xff]  }
  0x23   : > { %v1157_v14 = vshll.u32 %v2924_v58, 16  ;;  %v1047_v15 = vor.u32 %v1046_v3, %v1042_v60  ;;  %v1054_v16 = vshrl.u32 %v3279_v52, 16  ;;  %v1061_v18 = vshll.u32 %v2925_v62, 16  ;;  %v3350_v53 = vld [vmem:[%s3220_s20 + $0x2c] ss:$0 sps:$4 sm:$0x11]  }
  0x24   : > { %635 = vrot.lane.b32.xlu1 %v544_v54, %s3168_s23  ;;  %v1058_v17 = vrot.slane %v1056_v10, 1  ;;  %v1148_v19 = vsel %vm424_vm1, %v1143_v12, %v1147_v63  ;;  %v1155_v20 = vor.u32 %v1154_v13, %v1150_v8  ;;  %v1322_v25 = vrot.slane %v3223_v0, 1  ;;  %v3353_v54 = vld [vmem:[%s3220_s20 + $0x78] sm:$0xff]   ;;  %v3370_v8 = vld [vmem:[%s3220_s20 + $0x20] ss:$0 sps:$4 sm:$0x11]  }
  0x25   : > { %633 = vrot.lane.b32.xlu0 %v532_v6, %s3168_s23  ;;  %v1159_v21 = vrot.slane %v1157_v14, 1  ;;  %v1052_v5 = vsel %vm424_vm1, %v1047_v15, %v1051_v7  ;;  %v1063_v23 = vrot.slane %v1061_v18, 1  ;;  %v1323_v26 = vrot.slane %v2922_v44, 1  ;;  %v3367_v7 = vld [vmem:[%s3220_s20 + $0x80] ss:$0 sps:$4 sm:$0x11]  }
  0x26   : > { %v1059_v22 = vor.u32 %v1058_v17, %v1054_v16  ;;  %v1298_v28 = vrot.slane %v3226_v1, 1  ;;  %v1299_v29 = vrot.slane %v2923_v49, 1  ;;  %v1325_v32 = vrot.slane %v3267_v36, 1  ;;  %v3318_v1 = vld [vmem:[%s3220_s20 + $0x18] sm:$0xff]  }
  0x27   : > { %v1160_v24 = vsel %vm424_vm1, %v1155_v20, %v1159_v21  ;;  %v1324_v31 = vsel %vm682_vm0, %v1322_v25, %v1323_v26  ;;  %v1326_v0 = vrot.slane %v2924_v58, 1  ;;  %v1301_v34 = vrot.slane %v3279_v52, 1  ;;  %v3390_v26 = vld [vmem:[%s3220_s20 + $0x84] sm:$0xff]  }
  0x28   : > { %946 = vrot.lane.b32.xlu1 %v3267_v36, %s3166_s21  ;;  %v1064_v27 = vsel %vm424_vm1, %v1059_v22, %v1063_v23  ;;  %v1300_v33 = vsel %vm682_vm0, %v1298_v28, %v1299_v29  ;;  %v1302_v35 = vrot.slane %v2925_v62, 1  ;;  %v1755_v39 = vshll.u32 %v3309_v30, 16  ;;  %v3332_v36 = vld [vmem:[%s3220_s20 + $0x20] ss:$0 sps:$4 sm:$0x11]  }
  0x29   : > { %930 = vrot.lane.b32.xlu0 %v3279_v52, %s3166_s21  ;;  %v1327_v41 = vsel %vm682_vm0, %v1325_v32, %v1326_v0  ;;  %v1659_v43 = vshll.u32 %v3318_v1, 16  ;;  %v1753_v44 = vshrl.u32 %v3309_v30, 16  ;;  %v1760_v46 = vshll.u32 %v3321_v37, 16 }
  0x2a   : > { %v1303_v42 = vsel %vm682_vm0, %v1301_v34, %v1302_v35  ;;  %v1757_v45 = vrot.slane %v1755_v39, 1  ;;  %v1664_v47 = vshll.u32 %v3332_v36, 16  ;;  %v1767_v49 = vshll.u32 %v3324_v38, 16  ;;  %v3402_v35 = vld [vmem:[%s3220_s20 + $0x8c] ss:$0 sps:$4 sm:$0x11]  }
  0x2b   : > { %v1671_v50 = vshll.u32 %v3329_v40, 16  ;;  %v1657_v51 = vshrl.u32 %v3318_v1, 16  ;;  %v1661_v52 = vrot.slane %v1659_v43, 1  ;;  %v1762_v56 = vrot.slane %v1760_v46, 1 }
  0x2c   : > { %1249 = vrot.lane.b32.xlu1 %v1148_v19, %s3169_s24  ;;  %v1758_v55 = vor.u32 %v1757_v45, %v1753_v44  ;;  %v1765_v57 = vshrl.u32 %v3324_v38, 16  ;;  %v1669_v58 = vshrl.u32 %v3329_v40, 16  ;;  %v1666_v60 = vrot.slane %v1664_v47, 1 }
  0x2d   : > { %1233 = vrot.lane.b32.xlu0 %v1052_v5, %s3169_s24  ;;  %v1769_v61 = vrot.slane %v1767_v49, 1  ;;  %v1772_v62 = vshll.u32 %v3343_v48, 16  ;;  %v1673_v63 = vrot.slane %v1671_v50, 1  ;;  %v1662_v3 = vor.u32 %v1661_v52, %v1657_v51 }
  0x2e   : > { %v1676_v6 = vshll.u32 %v3350_v53, 16  ;;  %v1763_v10 = vsel %vm424_vm1, %v1758_v55, %v1762_v56  ;;  %v548_v14 = vshll.u32 %v3353_v54, 16  ;;  %v452_v18 = vshll.u32 %v3360_v59, 16 }
  0x2f   : > { %v1770_v12 = vor.u32 %v1769_v61, %v1765_v57  ;;  %v1774_v13 = vrot.slane %v1772_v62, 1  ;;  %v1667_v15 = vsel %vm424_vm1, %v1662_v3, %v1666_v60  ;;  %v1674_v16 = vor.u32 %v1673_v63, %v1669_v58 }
  0x30   : > { %1251 = vrot.lane.b32.xlu1 %v1160_v24, %s3169_s24  ;;  %v1678_v17 = vrot.slane %v1676_v6, 1  ;;  %v1937_v19 = vrot.slane %v3309_v30, 1  ;;  %v1938_v20 = vrot.slane %v3321_v37, 1  ;;  %v553_v21 = vshll.u32 %v3367_v7, 16 }
  0x31   : > { %1235 = vrot.lane.b32.xlu0 %v1064_v27, %s3169_s24  ;;  %v457_v5 = vshll.u32 %v3370_v8, 16  ;;  %v1775_v22 = vsel %vm424_vm1, %v1770_v12, %v1774_v13  ;;  %v1913_v23 = vrot.slane %v3318_v1, 1  ;;  %v546_v24 = vshrl.u32 %v3353_v54, 16  ;;  %v3438_v12 = vld [vmem:[%s3220_s20 + $0x90] sm:$0xff]  }
  0x32   : > { %v550_v25 = vrot.slane %v548_v14, 1  ;;  %v1679_v27 = vsel %vm424_vm1, %v1674_v16, %v1678_v17  ;;  %v1914_v28 = vrot.slane %v3332_v36, 1  ;;  %v450_v29 = vshrl.u32 %v3360_v59, 16  ;;  %v3407_v36 = vld [vmem:[%s3220_s20 + $0x2c] ss:$0 sps:$4 sm:$0x11]  }
  0x33   : > { %v555_v32 = vrot.slane %v553_v21, 1  ;;  %v459_v0 = vrot.slane %v457_v5, 1  ;;  %v1941_v43 = vrot.slane %v3343_v48, 1  ;;  %v1916_v44 = vrot.slane %v3329_v40, 1  ;;  %v3441_v13 = vld [vmem:[%s3220_s20 + $0x30] sm:$0xff]   ;;  %v3444_v14 = vld [vmem:[%s3220_s20 + $0x9c] sm:$0xff]  }
  0x34   : > { %1362 = vrot.lane.b32.xlu1 %v1324_v31, %s3170_s25  ;;  %v3396_v31 = vld [vmem:[%s3220_s20 + $0x24] sm:$0xff]   ;;  %v551_v34 = vor.u32 %v550_v25, %v546_v24  ;;  %v1915_v37 = vsel %vm682_vm0, %v1913_v23, %v1914_v28  ;;  %v1917_v45 = vrot.slane %v3350_v53, 1  ;;  %v558_v47 = vshrl.u32 %v3390_v26, 16  ;;  %v3517_v23 = vld [vmem:[%s3220_s20 + $0x2c] ss:$0 sps:$4 sm:$0x11]  }
  0x35   : > { %1346 = vrot.lane.b32.xlu0 %v1300_v33, %s3170_s25  ;;  %v1939_v33 = vsel %vm682_vm0, %v1937_v19, %v1938_v20  ;;  %v565_v50 = vshll.u32 %v3402_v35, 16  ;;  %v462_v52 = vshrl.u32 %v3396_v31, 16  ;;  %v469_v48 = vshll.u32 %v3407_v36, 16  ;;  %v3511_v20 = vld [vmem:[%s3220_s20 + $0x30] sm:$0xff]   ;;  %v2972_v28 = vld [vmem:[%s4391_s1] sm:$0xff]  }
  0x36   : > { %v556_v46 = vsel %vm424_vm1, %v551_v34, %v555_v32  ;;  %v1918_v56 = vsel %vm682_vm0, %v1916_v44, %v1917_v45  ;;  %v713_v61 = vrot.slane %v3353_v54, 1  ;;  %v714_v62 = vrot.slane %v3367_v7, 1  ;;  %v3534_v32 = vld [vmem:[%s3220_s20 + $0x38] ss:$0 sps:$4 sm:$0x11]   ;;  %2812 = vmatprep.subr.bf16.mxu0 %v2972_v28  ;;  %2860 = vmatprep.subr.bf16.mxu1 %v2972_v28  ;;  %v2976_v34 = vld [vmem:[%s4391_s1 + $0x10] sm:$0xff]  }
  0x37   : > { %v567_v55 = vrot.slane %v565_v50, 1  ;;  %v471_v58 = vrot.slane %v469_v48, 1  ;;  %v689_v3 = vrot.slane %v3360_v59, 1  ;;  %v690_v6 = vrot.slane %v3370_v8, 1  ;;  %2813 = vmatpush3.bf16.msra.mxu0 %v2972_v28  ;;  %2868 = vmatpush3.bf16.msra.mxu1 %v2972_v28 }
  0x38   : > { %1364 = vrot.lane.b32.xlu1 %v1327_v41, %s3170_s25  ;;  %v464_v41 = vshll.u32 %v3396_v31, 16  ;;  %v3174_v7 = vmov 0   ;;  %v715_v8 = vsel %vm682_vm0, %v713_v61, %v714_v62  ;;  %v716_v16 = vrot.slane %v3390_v26, 1  ;;  %v3624_v28 = vld [vmem:[%s3220_s20 + $0x44] ss:$0 sps:$4 sm:$0x11]  }
  0x39   : > { %1348 = vrot.lane.b32.xlu0 %v1303_v42, %s3170_s25  ;;  %v1940_v42 = vrot.slane %v3324_v38, 1  ;;  %197 = vst.msk [vmem:[#allocation2 + $0x8] sm:$0xff] %vm195_vm2, %v3174_v7  ;;  %196 = vst.msk [vmem:[#allocation2] sm:$0xff] %vm195_vm2, %v3174_v7  ;;  %v717_v17 = vrot.slane %v3402_v35, 1  ;;  %v1085_v45 = vshll.u32 %v3534_v32, 16 }
  0x3a   : > { %198 = vst.msk [vmem:[#allocation2 + $0x10] sm:$0xff] %vm195_vm2, %v3174_v7  ;;  %199 = vst.msk [vmem:[#allocation2 + $0x18] sm:$0xff] %vm195_vm2, %v3174_v7 }
  0x3b   : > { %200 = vst.msk [vmem:[#allocation2 + $0x20] sm:$0xff] %vm195_vm2, %v3174_v7  ;;  %201 = vst.msk [vmem:[#allocation2 + $0x28] sm:$0xff] %vm195_vm2, %v3174_v7  ;;  %v718_v19 = vsel %vm682_vm0, %v716_v16, %v717_v17  ;;  %v2986_v16 = vld [vmem:[%s4391_s1 + $0x30] sm:$0xff]   ;;  %v3591_v17 = vld [vmem:[%s3220_s20 + $0x9c] sm:$0xff]  }
  0x3c   : > { %1559 = vrot.lane.b32.xlu1 %v3309_v30, %s3171_s26  ;;  %v454_v30 = vrot.slane %v452_v18, 1  ;;  %202 = vst.msk [vmem:[#allocation2 + $0x30] sm:$0xff] %vm195_vm2, %v3174_v7  ;;  %203 = vst.msk [vmem:[#allocation2 + $0x38] sm:$0xff] %vm195_vm2, %v3174_v7  ;;  %v3471_v18 = vld [vmem:[%s3220_s20 + $0x24] sm:$0xff]  }
  0x3d   : > { %1543 = vrot.lane.b32.xlu0 %v3318_v1, %s3171_s26  ;;  %v560_v1 = vshll.u32 %v3390_v26, 16  ;;  %204 = vst.msk [vmem:[#allocation2 + $0x40] sm:$0xff] %vm195_vm2, %v3174_v7  ;;  %205 = vst.msk [vmem:[#allocation2 + $0x48] sm:$0xff] %vm195_vm2, %v3174_v7  ;;  %v1068_v5 = vshll.u32 %v3471_v18, 16  ;;  %v1066_v24 = vshrl.u32 %v3471_v18, 16 }
  0x3e   : > { %v455_v39 = vor.u32 %v454_v30, %v450_v29  ;;  %206 = vst.msk [vmem:[#allocation2 + $0x50] sm:$0xff] %vm195_vm2, %v3174_v7  ;;  %207 = vst.msk [vmem:[#allocation2 + $0x58] sm:$0xff] %vm195_vm2, %v3174_v7  ;;  %v3527_v29 = vld [vmem:[%s3220_s20 + $0x98] ss:$0 sps:$4 sm:$0x11]   ;;  %v2975_v30 = vld [vmem:[%s4391_s1 + $0x8] sm:$0xff]  }
  0x3f   : > { %v562_v49 = vrot.slane %v560_v1, 1  ;;  %208 = vst.msk [vmem:[#allocation2 + $0x60] sm:$0xff] %vm195_vm2, %v3174_v7  ;;  %209 = vst.msk [vmem:[#allocation2 + $0x68] sm:$0xff] %vm195_vm2, %v3174_v7  ;;  %2814 = vmatprep.subr.bf16.mxu0 %v2975_v30  ;;  %v1078_v1 = vshrl.u32 %v3511_v20, 16  ;;  %2861 = vmatprep.subr.bf16.mxu1 %v2975_v30 }
  0x40   : > { %1561 = vrot.lane.b32.xlu1 %v3324_v38, %s3171_s26  ;;  %v460_v51 = vsel %vm424_vm1, %v455_v39, %v459_v0  ;;  %v466_v38 = vrot.slane %v464_v41, 1  ;;  %210 = vst.msk [vmem:[#allocation2 + $0x70] sm:$0xff] %vm195_vm2, %v3174_v7  ;;  %211 = vst.msk [vmem:[#allocation2 + $0x78] sm:$0xff] %vm195_vm2, %v3174_v7  ;;  %v1073_v0 = vshll.u32 %v3517_v23, 16  ;;  %v1181_v41 = vshll.u32 %v3527_v29, 16  ;;  %2815 = vmatpush3.bf16.msra.mxu0 %v2975_v30 }
  0x41   : > { %1545 = vrot.lane.b32.xlu0 %v3329_v40, %s3171_s26  ;;  %v1942_v40 = vsel %vm682_vm0, %v1940_v42, %v1941_v43  ;;  %v563_v53 = vor.u32 %v562_v49, %v558_v47  ;;  %361 = vst.msk [vmem:[#allocation2 + $0x8] sm:$0xff] %vm359_vm3, %v3247_v11  ;;  %360 = vst.msk [vmem:[#allocation2] sm:$0xff] %vm359_vm3, %v3237_v4  ;;  %v692_v4 = vrot.slane %v3396_v31, 1  ;;  %v3501_v11 = vld [vmem:[%s3220_s20 + $0x90] sm:$0xff]   ;;  %2869 = vmatpush3.bf16.msra.mxu1 %v2975_v30  ;;  %v3630_v30 = vld [vmem:[%s3220_s20 + $0x48] sm:$0xff]  }
  0x42   : > { %v467_v57 = vor.u32 %v466_v38, %v462_v52  ;;  %362 = vst.msk [vmem:[#allocation2 + $0x10] sm:$0xff] %vm359_vm3, %v3360_v59  ;;  %363 = vst.msk [vmem:[#allocation2 + $0x18] sm:$0xff] %vm359_vm3, %v3396_v31  ;;  %v1070_v31 = vrot.slane %v1068_v5, 1  ;;  %v1174_v35 = vshrl.u32 %v3501_v11, 16  ;;  %v1075_v43 = vrot.slane %v1073_v0, 1  ;;  %2816 = vmatprep.subr.bf16.mxu0 %v2976_v34  ;;  %2862 = vmatprep.subr.bf16.mxu1 %v2976_v34 }
  0x43   : > { %v568_v60 = vsel %vm424_vm1, %v563_v53, %v567_v55  ;;  %364 = vst.msk [vmem:[#allocation2 + $0x20] sm:$0xff] %vm359_vm3, %v3441_v13  ;;  %368 = vst.msk [vmem:[#allocation2 + $0x40] sm:$0xff] %vm359_vm3, %v3233_v2  ;;  %v691_v2 = vsel %vm682_vm0, %v689_v3, %v690_v6  ;;  %v1183_v50 = vrot.slane %v1181_v41, 1  ;;  %v1087_v38 = vrot.slane %v1085_v45, 1  ;;  %v2980_v55 = vld [vmem:[%s4391_s1 + $0x20] sm:$0xff]   ;;  %v3578_v3 = vld [vmem:[%s3220_s20 + $0x90] sm:$0xff]  }
  0x44   : > { %1864 = vrot.lane.b32.xlu1 %v1763_v10, %s3172_s27  ;;  %v472_v63 = vsel %vm424_vm1, %v467_v57, %v471_v58  ;;  %v3435_v10 = vld [vmem:[%s3220_s20 + $0x84] sm:$0xff]   ;;  %369 = vst.msk [vmem:[#allocation2 + $0x48] sm:$0xff] %vm359_vm3, %v3243_v9  ;;  %370 = vst.msk [vmem:[#allocation2 + $0x50] sm:$0xff] %vm359_vm3, %v3353_v54  ;;  %v693_v9 = vrot.slane %v3407_v36, 1  ;;  %v1071_v42 = vor.u32 %v1070_v31, %v1066_v24  ;;  %2817 = vmatpush3.bf16.msra.mxu0 %v2976_v34 }
  0x45   : > { %1848 = vrot.lane.b32.xlu0 %v1667_v15, %s3172_s27  ;;  %v3447_v15 = vld [vmem:[%s3220_s20 + $0x3c] sm:$0xff]   ;;  %371 = vst.msk [vmem:[#allocation2 + $0x58] sm:$0xff] %vm359_vm3, %v3390_v26  ;;  %372 = vst.msk [vmem:[#allocation2 + $0x60] sm:$0xff] %vm359_vm3, %v3438_v12  ;;  %v3504_v54 = vld [vmem:[%s3220_s20 + $0x8c] ss:$0 sps:$4 sm:$0x11]   ;;  %2870 = vmatpush3.bf16.msra.mxu1 %v2976_v34 }
  0x46   : > { %373 = vst.msk [vmem:[#allocation2 + $0x68] sm:$0xff] %vm359_vm3, %v3444_v14  ;;  %365 = vst.msk [vmem:[#allocation2 + $0x28] sm:$0xff] %vm359_vm3, %v3447_v15  ;;  %v1164_v59 = vshll.u32 %v3435_v10, 16  ;;  %v1162_v21 = vshrl.u32 %v3435_v10, 16  ;;  %v1169_v26 = vshll.u32 %v3504_v54, 16  ;;  %v1329_v53 = vrot.slane %v3504_v54, 1 }
  0x47   : > { %v1304_v57 = vrot.slane %v3471_v18, 1  ;;  %v1305_v58 = vrot.slane %v3517_v23, 1  ;;  %v1331_v62 = vrot.slane %v3501_v11, 1  ;;  %v1308_v7 = vrot.slane %v3534_v32, 1  ;;  %v3604_v54 = vld [vmem:[%s3220_s20 + $0x3c] sm:$0xff]   ;;  %366 = vst.msk [vmem:[#allocation2 + $0x30] sm:$0xff] %vm359_vm3, %v3630_v30 }
  0x48   : > { %1866 = vrot.lane.b32.xlu1 %v1775_v22, %s3172_s27  ;;  %v694_v22 = vsel %vm682_vm0, %v692_v4, %v693_v9  ;;  %v1166_v25 = vrot.slane %v1164_v59, 1  ;;  %v1171_v39 = vrot.slane %v1169_v26, 1  ;;  %v1779_v4 = vshll.u32 %v3578_v3, 16  ;;  %v3600_v9 = vld [vmem:[%s3220_s20 + $0x38] ss:$0 sps:$4 sm:$0x11]  }
  0x49   : > { %1850 = vrot.lane.b32.xlu0 %v1679_v27, %s3172_s27  ;;  %v1176_v27 = vshll.u32 %v3501_v11, 16  ;;  %v1306_v6 = vsel %vm682_vm0, %v1304_v57, %v1305_v58  ;;  %v1777_v59 = vshrl.u32 %v3578_v3, 16  ;;  %v3614_v5 = vld [vmem:[%s3220_s20 + $0xa4] ss:$0 sps:$4 sm:$0x11]   ;;  %v1791_v26 = vshll.u32 %v3591_v17, 16 }
  0x4a   : > { %v1781_v23 = vrot.slane %v1779_v4, 1  ;;  %v1789_v31 = vshrl.u32 %v3591_v17, 16  ;;  %v1796_v32 = vshll.u32 %v3614_v5, 16  ;;  %v1700_v41 = vshll.u32 %v3624_v28, 16 }
  0x4b   : > { %v1178_v36 = vrot.slane %v1176_v27, 1  ;;  %v1793_v34 = vrot.slane %v1791_v26, 1  ;;  %v572_v45 = vshll.u32 %v3438_v12, 16  ;;  %v3686_v4 = vld [vmem:[%s3220_s20 + $0xa4] ss:$0 sps:$4 sm:$0x11]  }
  0x4c   : > { %1977 = vrot.lane.b32.xlu1 %v1939_v33, %s3173_s28  ;;  %v1080_v33 = vshll.u32 %v3511_v20, 16  ;;  %v1782_v0 = vor.u32 %v1781_v23, %v1777_v59  ;;  %v1946_v23 = vrot.slane %v3591_v17, 1  ;;  %v1923_v26 = vrot.slane %v3624_v28, 1 }
  0x4d   : > { %1961 = vrot.lane.b32.xlu0 %v1915_v37, %s3173_s28  ;;  %v1167_v37 = vor.u32 %v1166_v25, %v1162_v21  ;;  %v1179_v49 = vor.u32 %v1178_v36, %v1174_v35  ;;  %v2989_v21 = vld [vmem:[%s4391_s1 + $0x38] sm:$0xff]   ;;  %v1688_v25 = vshll.u32 %v3600_v9, 16  ;;  %v1693_v35 = vshrl.u32 %v3604_v54, 16 }
  0x4e   : > { %v1082_v44 = vrot.slane %v1080_v33, 1 }
  0x4f   : > { %v1172_v47 = vsel %vm424_vm1, %v1167_v37, %v1171_v39  ;;  %v1184_v48 = vsel %vm424_vm1, %v1179_v49, %v1183_v50  ;;  %v1690_v39 = vrot.slane %v1688_v25, 1  ;;  %v1794_v49 = vor.u32 %v1793_v34, %v1789_v31 }
  0x50   : > { %637 = vrot.lane.b32.xlu1 %v556_v46, %s3168_s23  ;;  %v2977_v46 = vld [vmem:[%s4391_s1 + $0x18] sm:$0xff]   ;;  %v1083_v52 = vor.u32 %v1082_v44, %v1078_v1  ;;  %v1798_v44 = vrot.slane %v1796_v32, 1  ;;  %v1922_v25 = vrot.slane %v3604_v54, 1  ;;  %v582_v31 = vshrl.u32 %v3444_v14, 16 }
  0x51   : > { %621 = vrot.lane.b32.xlu0 %v460_v51, %s3168_s23  ;;  %v1076_v51 = vsel %vm424_vm1, %v1071_v42, %v1075_v43  ;;  %2818 = vmatprep.subr.bf16.mxu0 %v2977_v46  ;;  %v3642_v1 = vld [vmem:[%s3220_s20 + $0xb4] sm:$0xff]  }
  0x52   : > { %2863 = vmatprep.subr.bf16.mxu1 %v2977_v46  ;;  %2819 = vmatpush3.bf16.msra.mxu0 %v2977_v46  ;;  %v3646_v42 = vld [vmem:[%s3220_s20 + $0x54] sm:$0xff]   ;;  %375 = vst.msk [vmem:[#allocation2 + $0x78] sm:$0xff] %vm359_vm3, %v3642_v1 }
  0x53   : > { %2871 = vmatpush3.bf16.msra.mxu1 %v2977_v46  ;;  %2820 = vmatprep.subr.bf16.mxu0 %v2980_v55  ;;  %v3649_v43 = vld [vmem:[%s3220_s20 + $0x98] ss:$0 sps:$4 sm:$0x11]   ;;  %367 = vst.msk [vmem:[#allocation2 + $0x38] sm:$0xff] %vm359_vm3, %v3646_v42 }
  0x54   : > { %1979 = vrot.lane.b32.xlu1 %v1942_v40, %s3173_s28  ;;  %v1328_v40 = vrot.slane %v3435_v10, 1  ;;  %2864 = vmatprep.subr.bf16.mxu1 %v2980_v55  ;;  %v3657_v46 = vld [vmem:[%s3220_s20 + $0x38] ss:$0 sps:$4 sm:$0x11]  }
  0x55   : > { %1963 = vrot.lane.b32.xlu0 %v1918_v56, %s3173_s28  ;;  %v1088_v56 = vsel %vm424_vm1, %v1083_v52, %v1087_v38  ;;  %v1702_v52 = vrot.slane %v1700_v41, 1  ;;  %v476_v38 = vshll.u32 %v3441_v13, 16  ;;  %v481_v57 = vshll.u32 %v3657_v46, 16 }
  0x56   : > { %v1330_v61 = vsel %vm682_vm0, %v1328_v40, %v1329_v53  ;;  %2821 = vmatpush3.bf16.msra.mxu0 %v2980_v55  ;;  %v1943_v40 = vrot.slane %v3578_v3, 1 }
  0x57   : > { %2872 = vmatpush3.bf16.msra.mxu1 %v2980_v55 }
  0x58   : > { %639 = vrot.lane.b32.xlu1 %v568_v60, %s3168_s23  ;;  %v2983_v60 = vld [vmem:[%s4391_s1 + $0x28] sm:$0xff]  }
  0x59   : > { %623 = vrot.lane.b32.xlu0 %v472_v63, %s3168_s23  ;;  %v1332_v63 = vrot.slane %v3527_v29, 1  ;;  %2822 = vmatprep.subr.bf16.mxu0 %v2983_v60  ;;  %v1695_v29 = vshll.u32 %v3604_v54, 16 }
  0x5a   : > { %2865 = vmatprep.subr.bf16.mxu1 %v2983_v60  ;;  %2823 = vmatpush3.bf16.msra.mxu0 %v2983_v60 }
  0x5b   : > { %2873 = vmatpush3.bf16.msra.mxu1 %v2983_v60  ;;  %2824 = vmatprep.subr.bf16.mxu0 %v2986_v16  ;;  %v1697_v36 = vrot.slane %v1695_v29, 1  ;;  %v1799_v60 = vsel %vm424_vm1, %v1794_v49, %v1798_v44  ;;  %v719_v49 = vrot.slane %v3438_v12, 1 }
  0x5c   : > { %751 = vrot.lane.b32.xlu1 %v715_v8, %s3167_s22  ;;  %v3584_v8 = vld [vmem:[%s3220_s20 + $0x30] sm:$0xff]   ;;  %2866 = vmatprep.subr.bf16.mxu1 %v2986_v16 }
  0x5d   : > { %735 = vrot.lane.b32.xlu0 %v691_v2, %s3167_s22  ;;  %v1333_v2 = vsel %vm682_vm0, %v1331_v62, %v1332_v63  ;;  %v1919_v55 = vrot.slane %v3584_v8, 1  ;;  %v570_v62 = vshrl.u32 %v3438_v12, 16  ;;  %v574_v63 = vrot.slane %v572_v45, 1  ;;  %v3729_v12 = vld [vmem:[%s3220_s20 + $0x9c] sm:$0xff]  }
  0x5e   : > { %2825 = vmatpush3.bf16.msra.mxu0 %v2986_v16 }
  0x5f   : > { %2874 = vmatpush3.bf16.msra.mxu1 %v2986_v16  ;;  %2826 = vmatprep.subr.bf16.mxu0 %v2989_v21 }
  0x60   : > { %753 = vrot.lane.b32.xlu1 %v718_v19, %s3167_s22  ;;  %v1683_v19 = vshll.u32 %v3584_v8, 16  ;;  %2867 = vmatprep.subr.bf16.mxu1 %v2989_v21 }
  0x61   : > { %737 = vrot.lane.b32.xlu0 %v694_v22, %s3167_s22  ;;  %v3617_v22 = vld [vmem:[%s3220_s20 + $0xa8] sm:$0xff]  }
  0x62   : > { %v1685_v27 = vrot.slane %v1683_v19, 1  ;;  %374 = vst.msk [vmem:[#allocation2 + $0x70] sm:$0xff] %vm359_vm3, %v3617_v22  ;;  %2827 = vmatpush3.bf16.msra.mxu0 %v2989_v21  ;;  %v3691_v19 = vld [vmem:[%s3220_s20 + $0x44] ss:$0 sps:$4 sm:$0x11]  }
  0x63   : > { %2875 = vmatpush3.bf16.msra.mxu1 %v2989_v21 }
  0x64   : > { %948 = vrot.lane.b32.xlu1 %v3435_v10, %s3166_s21  ;;  %v1307_v10 = vrot.slane %v3511_v20, 1 }
  0x65   : > { %932 = vrot.lane.b32.xlu0 %v3471_v18, %s3166_s21  ;;  %v3594_v18 = vld [vmem:[%s3220_s20 + $0x98] ss:$0 sps:$4 sm:$0x11]  }
  0x66   : > { %v1784_v24 = vshll.u32 %v3594_v18, 16  ;;  %v1944_v53 = vrot.slane %v3594_v18, 1 }
  0x68   : > { %950 = vrot.lane.b32.xlu1 %v3501_v11, %s3166_s21  ;;  %v1309_v11 = vsel %vm682_vm0, %v1307_v10, %v1308_v7  ;;  %v1786_v33 = vrot.slane %v1784_v24, 1  ;;  %v478_v10 = vrot.slane %v476_v38, 1  ;;  %v1945_v18 = vsel %vm682_vm0, %v1943_v40, %v1944_v53 }
  0x69   : > { %934 = vrot.lane.b32.xlu0 %v3511_v20, %s3166_s21  ;;  %v1681_v20 = vshrl.u32 %v3584_v8, 16  ;;  %v1947_v24 = vrot.slane %v3614_v5, 1  ;;  %v493_v5 = vshll.u32 %v3691_v19, 16  ;;  %v695_v38 = vrot.slane %v3441_v13, 1 }
  0x6a   : > { %v696_v40 = vrot.slane %v3657_v46, 1  ;;  %v723_v46 = vrot.slane %v3686_v4, 1 }
  0x6b   : > { %v1686_v37 = vor.u32 %v1685_v27, %v1681_v20  ;;  %v488_v20 = vshll.u32 %v3447_v15, 16  ;;  %v1948_v28 = vsel %vm682_vm0, %v1946_v23, %v1947_v24  ;;  %v495_v44 = vrot.slane %v493_v5, 1 }
  0x6c   : > { %1253 = vrot.lane.b32.xlu1 %v1172_v47, %s3169_s24  ;;  %v1787_v47 = vsel %vm424_vm1, %v1782_v0, %v1786_v33  ;;  %v589_v0 = vshll.u32 %v3686_v4, 16 }
  0x6d   : > { %1237 = vrot.lane.b32.xlu0 %v1076_v51, %s3169_s24  ;;  %v1691_v50 = vsel %vm424_vm1, %v1686_v37, %v1690_v39  ;;  %v1698_v51 = vor.u32 %v1697_v36, %v1693_v35  ;;  %v490_v34 = vrot.slane %v488_v20, 1  ;;  %v1924_v36 = vsel %vm682_vm0, %v1922_v25, %v1923_v26 }
  0x6e   : > { %v591_v37 = vrot.slane %v589_v0, 1 }
  0x70   : > { %1255 = vrot.lane.b32.xlu1 %v1184_v48, %s3169_s24 }
  0x71   : > { %1239 = vrot.lane.b32.xlu0 %v1088_v56, %s3169_s24  ;;  %v577_v56 = vshll.u32 %v3649_v43, 16 }
  0x73   : > { %v579_v7 = vrot.slane %v577_v56, 1  ;;  %v697_v56 = vsel %vm682_vm0, %v695_v38, %v696_v40 }
  0x74   : > { %1366 = vrot.lane.b32.xlu1 %v1330_v61, %s3170_s25  ;;  %v1920_v61 = vrot.slane %v3600_v9, 1  ;;  %v584_v9 = vshll.u32 %v3444_v14, 16 }
  0x75   : > { %1350 = vrot.lane.b32.xlu0 %v1306_v6, %s3170_s25  ;;  %v474_v6 = vshrl.u32 %v3441_v13, 16 }
  0x76   : > { %v586_v32 = vrot.slane %v584_v9, 1  ;;  %v3772_v9 = vld [vmem:[%s3220_s20 + $0xb0] ss:$0 sps:$4 sm:$0x11]  }
  0x77   : > { %v479_v59 = vor.u32 %v478_v10, %v474_v6  ;;  %v3758_v6 = vld [vmem:[%s3220_s20 + $0x48] sm:$0xff]   ;;  %v3761_v10 = vld [vmem:[%s3220_s20 + $0x44] ss:$0 sps:$4 sm:$0x11]  }
  0x78   : > { %1368 = vrot.lane.b32.xlu1 %v1333_v2, %s3170_s25  ;;  %v575_v2 = vor.u32 %v574_v63, %v570_v62  ;;  %v587_v35 = vor.u32 %v586_v32, %v582_v31  ;;  %v3754_v62 = vld [vmem:[%s3220_s20 + $0xa4] ss:$0 sps:$4 sm:$0x11]   ;;  %v1097_v20 = vshll.u32 %v3761_v10, 16  ;;  %v1104_v23 = vshll.u32 %v3758_v6, 16 }
  0x79   : > { %1352 = vrot.lane.b32.xlu0 %v1309_v11, %s3170_s25  ;;  %v1921_v11 = vsel %vm682_vm0, %v1919_v55, %v1920_v61  ;;  %v1205_v31 = vshll.u32 %v3772_v9, 16  ;;  %v1102_v32 = vshrl.u32 %v3758_v6, 16  ;;  %v1311_v40 = vrot.slane %v3761_v10, 1  ;;  %v3839_v10 = vld [vmem:[%s3220_s20 + $0x54] sm:$0xff]  }
  0x7a   : > { %v580_v29 = vsel %vm424_vm1, %v575_v2, %v579_v7  ;;  %v1193_v2 = vshll.u32 %v3754_v62, 16 }
  0x7c   : > { %1563 = vrot.lane.b32.xlu1 %v3578_v3, %s3171_s26  ;;  %v1703_v3 = vsel %vm424_vm1, %v1698_v51, %v1702_v52 }
  0x7d   : > { %1547 = vrot.lane.b32.xlu0 %v3584_v8, %s3171_s26  ;;  %v483_v8 = vrot.slane %v481_v57, 1  ;;  %v698_v57 = vrot.slane %v3447_v15, 1 }
  0x7f   : > { %v484_v33 = vsel %vm424_vm1, %v479_v59, %v483_v8 }
  0x80   : > { %1565 = vrot.lane.b32.xlu1 %v3591_v17, %s3171_s26  ;;  %v486_v17 = vshrl.u32 %v3447_v15, 16  ;;  %v3751_v15 = vld [vmem:[%s3220_s20 + $0xa8] sm:$0xff]  }
  0x81   : > { %1549 = vrot.lane.b32.xlu0 %v3604_v54, %s3171_s26  ;;  %v1198_v26 = vshrl.u32 %v3751_v15, 16 }
  0x82   : > { %v491_v41 = vor.u32 %v490_v34, %v486_v17  ;;  %v1099_v17 = vrot.slane %v1097_v20, 1  ;;  %v1106_v34 = vrot.slane %v1104_v23, 1  ;;  %v1719_v23 = vshll.u32 %v3839_v10, 16 }
  0x84   : > { %1868 = vrot.lane.b32.xlu1 %v1787_v47, %s3172_s27  ;;  %v592_v47 = vsel %vm424_vm1, %v587_v35, %v591_v37  ;;  %v496_v52 = vsel %vm424_vm1, %v491_v41, %v495_v44  ;;  %v1207_v37 = vrot.slane %v1205_v31, 1  ;;  %v1107_v41 = vor.u32 %v1106_v34, %v1102_v32 }
  0x85   : > { %1852 = vrot.lane.b32.xlu0 %v1691_v50, %s3172_s27  ;;  %v720_v50 = vrot.slane %v3649_v43, 1  ;;  %v722_v43 = vrot.slane %v3444_v14, 1  ;;  %v1721_v34 = vrot.slane %v1719_v23, 1  ;;  %v1928_v23 = vrot.slane %v3839_v10, 1 }
  0x86   : > { %v3666_v48 = vpop.permute.xlu1 %944 }
  0x87   : > { %v3675_v58 = vpop.permute.xlu0 %928  ;;  %v721_v13 = vsel %vm682_vm0, %v719_v49, %v720_v50  ;;  %v724_v61 = vsel %vm682_vm0, %v722_v43, %v723_v46  ;;  %v1334_v49 = vrot.slane %v3729_v12, 1  ;;  %v1335_v50 = vrot.slane %v3754_v62, 1  ;;  %v3816_v46 = vld [vmem:[%s3220_s20 + $0xa8] sm:$0xff]  }
  0x88   : > { %1870 = vrot.lane.b32.xlu1 %v1799_v60, %s3172_s27  ;;  %v3742_v60 = vld [vmem:[%s3220_s20 + $0x3c] sm:$0xff]   ;;  %v1338_v43 = vrot.slane %v3772_v9, 1  ;;  %v1803_v62 = vshll.u32 %v3816_v46, 16 }
  0x89   : > { %1854 = vrot.lane.b32.xlu0 %v1703_v3, %s3172_s27  ;;  %v1092_v7 = vshll.u32 %v3742_v60, 16  ;;  %v1090_v4 = vshrl.u32 %v3742_v60, 16  ;;  %v1310_v38 = vrot.slane %v3742_v60, 1 }
  0x8a   : > { %v748_v16 = vpop.permute.xlu1 %747 }
  0x8b   : > { %v732_v21 = vpop.permute.xlu0 %731 }
  0x8c   : > { %1981 = vrot.lane.b32.xlu1 %v1945_v18, %s3173_s28 }
  0x8d   : > { %1965 = vrot.lane.b32.xlu0 %v1921_v11, %s3173_s28  ;;  %v1200_v11 = vshll.u32 %v3751_v15, 16 }
  0x8e   : > { %v750_v27 = vpop.permute.xlu1 %749 }
  0x8f   : > { %v734_v54 = vpop.permute.xlu0 %733 }
  0x90   : > { %641 = vrot.lane.b32.xlu1 %v580_v29, %s3168_s23  ;;  %v1202_v29 = vrot.slane %v1200_v11, 1  ;;  %v3852_v11 = vld [vmem:[%s3220_s20 + $0xbc] ss:$0 sps:$4 sm:$0x11]  }
  0x91   : > { %625 = vrot.lane.b32.xlu0 %v484_v33, %s3168_s23  ;;  %v1820_v32 = vshll.u32 %v3852_v11, 16 }
  0x92   : > { %v620_v39 = vpop.permute.xlu1 %619  ;;  %v1203_v35 = vor.u32 %v1202_v29, %v1198_v26 }
  0x93   : > { %667 = vst.msk [vmem:[#allocation2 + $0x8] sm:$0xff] %vm665_vm4, %v620_v39  ;;  %v618_v45 = vpop.permute.xlu0 %617 }
  0x94   : > { %666 = vst.msk [vmem:[#allocation2] sm:$0xff] %vm665_vm4, %v618_v45  ;;  %1983 = vrot.lane.b32.xlu1 %v1948_v28, %s3173_s28 }
  0x95   : > { %781 = vst.msk [vmem:[#allocation2 + $0x8] sm:$0xff] %vm779_vm5, %v734_v54  ;;  %780 = vst.msk [vmem:[#allocation2] sm:$0xff] %vm779_vm5, %v732_v21  ;;  %1967 = vrot.lane.b32.xlu0 %v1924_v36, %s3173_s28  ;;  %v3777_v21 = vld [vmem:[%s3220_s20 + $0x50] ss:$0 sps:$4 sm:$0x11]  }
  0x96   : > { %v636_v51 = vpop.permute.xlu1 %635  ;;  %977 = vst.msk [vmem:[#allocation2] sm:$0xff] %vm976_vm6, %v3675_v58  ;;  %v699_v58 = vrot.slane %v3691_v19, 1  ;;  %v1094_v19 = vrot.slane %v1092_v7, 1  ;;  %v1109_v5 = vshll.u32 %v3777_v21, 16 }
  0x97   : > { %675 = vst.msk [vmem:[#allocation2 + $0x48] sm:$0xff] %vm665_vm4, %v636_v51  ;;  %v634_v53 = vpop.permute.xlu0 %633  ;;  %v3842_v7 = vld [vmem:[%s3220_s20 + $0x50] ss:$0 sps:$4 sm:$0x11]  }
  0x98   : > { %789 = vst.msk [vmem:[#allocation2 + $0x48] sm:$0xff] %vm779_vm5, %v750_v27  ;;  %643 = vrot.lane.b32.xlu1 %v592_v47, %s3168_s23  ;;  %v700_v3 = vsel %vm682_vm0, %v698_v57, %v699_v58  ;;  %v1195_v27 = vrot.slane %v1193_v2, 1  ;;  %v1095_v33 = vor.u32 %v1094_v19, %v1090_v4  ;;  %v1111_v44 = vrot.slane %v1109_v5, 1 }
  0x99   : > { %674 = vst.msk [vmem:[#allocation2 + $0x40] sm:$0xff] %vm665_vm4, %v634_v53  ;;  %627 = vrot.lane.b32.xlu0 %v496_v52, %s3168_s23  ;;  %v1208_v47 = vsel %vm424_vm1, %v1203_v35, %v1207_v37  ;;  %v1312_v57 = vsel %vm682_vm0, %v1310_v38, %v1311_v40  ;;  %v1313_v58 = vrot.slane %v3758_v6, 1  ;;  %v1805_v4 = vrot.slane %v1803_v62, 1 }
  0x9a   : > { %788 = vst.msk [vmem:[#allocation2 + $0x40] sm:$0xff] %vm779_vm5, %v748_v16  ;;  %v947_v55 = vpop.permute.xlu1 %946  ;;  %v1186_v16 = vshrl.u32 %v3729_v12, 16  ;;  %v1100_v36 = vsel %vm424_vm1, %v1095_v33, %v1099_v17  ;;  %v1112_v52 = vsel %vm424_vm1, %v1107_v41, %v1111_v44  ;;  %v1712_v20 = vshll.u32 %v3842_v7, 16 }
  0x9b   : > { %985 = vst.msk [vmem:[#allocation2 + $0x40] sm:$0xff] %vm976_vm6, %v3666_v48  ;;  %986 = vst.msk [vmem:[#allocation2 + $0x48] sm:$0xff] %vm976_vm6, %v947_v55  ;;  %v931_v14 = vpop.permute.xlu0 %930  ;;  %v1188_v48 = vshll.u32 %v3729_v12, 16  ;;  %v3819_v55 = vld [vmem:[%s3220_s20 + $0x48] sm:$0xff]   ;;  %v1717_v17 = vshrl.u32 %v3839_v10, 16  ;;  %v1822_v37 = vrot.slane %v1820_v32, 1 }
  0x9c   : > { %978 = vst.msk [vmem:[#allocation2 + $0x8] sm:$0xff] %vm976_vm6, %v931_v14  ;;  %755 = vrot.lane.b32.xlu1 %v721_v13, %s3167_s22  ;;  %v1337_v13 = vrot.slane %v3751_v15, 1  ;;  %v1705_v2 = vshrl.u32 %v3819_v55, 16  ;;  %v1714_v33 = vrot.slane %v1712_v20, 1  ;;  %v1925_v40 = vrot.slane %v3819_v55, 1 }
  0x9d   : > { %739 = vrot.lane.b32.xlu0 %v697_v56, %s3167_s22  ;;  %v1190_v18 = vrot.slane %v1188_v48, 1  ;;  %v3828_v48 = vld [vmem:[%s3220_s20 + $0xb0] ss:$0 sps:$4 sm:$0x11]   ;;  %v1953_v20 = vrot.slane %v3852_v11, 1 }
  0x9e   : > { %v1250_v63 = vpop.permute.xlu1 %1249  ;;  %v1950_v38 = vrot.slane %v3828_v48, 1 }
  0x9f   : > { %1290 = vst.msk [vmem:[#allocation2 + $0x40] sm:$0xff] %vm1281_vm7, %v1250_v63  ;;  %v1234_v8 = vpop.permute.xlu0 %1233  ;;  %v1191_v25 = vor.u32 %v1190_v18, %v1186_v16  ;;  %v1707_v63 = vshll.u32 %v3819_v55, 16  ;;  %v1801_v16 = vshrl.u32 %v3816_v46, 16  ;;  %v1808_v18 = vshll.u32 %v3828_v48, 16 }
  0xa0   : > { %1282 = vst.msk [vmem:[#allocation2] sm:$0xff] %vm1281_vm7, %v1234_v8  ;;  %757 = vrot.lane.b32.xlu1 %v724_v61, %s3167_s22  ;;  %v1339_v61 = vsel %vm682_vm0, %v1337_v13, %v1338_v43  ;;  %v594_v13 = vshrl.u32 %v3617_v22, 16 }
  0xa1   : > { %741 = vrot.lane.b32.xlu0 %v700_v3, %s3167_s22  ;;  %v1196_v28 = vsel %vm424_vm1, %v1191_v25, %v1195_v27  ;;  %v1709_v9 = vrot.slane %v1707_v63, 1  ;;  %v1810_v25 = vrot.slane %v1808_v18, 1  ;;  %v1806_v27 = vor.u32 %v1805_v4, %v1801_v16  ;;  %v3911_v4 = vld [vmem:[%s3220_s20 + $0x5c] ss:$0 sps:$4 sm:$0x11]  }
  0xa2   : > { %v1252_v59 = vpop.permute.xlu1 %1251 }
  0xa3   : > { %1291 = vst.msk [vmem:[#allocation2 + $0x48] sm:$0xff] %vm1281_vm7, %v1252_v59  ;;  %v1236_v24 = vpop.permute.xlu0 %1235  ;;  %v1710_v29 = vor.u32 %v1709_v9, %v1705_v2  ;;  %v512_v9 = vshll.u32 %v3646_v42, 16 }
  0xa4   : > { %1283 = vst.msk [vmem:[#allocation2 + $0x8] sm:$0xff] %vm1281_vm7, %v1236_v24  ;;  %952 = vrot.lane.b32.xlu1 %v3729_v12, %s3166_s21  ;;  %v1336_v12 = vsel %vm682_vm0, %v1334_v49, %v1335_v50  ;;  %v3883_v49 = vld [vmem:[%s3220_s20 + $0x50] ss:$0 sps:$4 sm:$0x11]   ;;  %v500_v50 = vshll.u32 %v3630_v30, 16 }
  0xa5   : > { %936 = vrot.lane.b32.xlu0 %v3742_v60, %s3166_s21  ;;  %v1314_v60 = vrot.slane %v3777_v21, 1  ;;  %v3857_v21 = vld [vmem:[%s3220_s20 + $0x5c] ss:$0 sps:$4 sm:$0x11]   ;;  %v1715_v44 = vsel %vm424_vm1, %v1710_v29, %v1714_v33  ;;  %v514_v11 = vrot.slane %v512_v9, 1 }
  0xa6   : > { %v1363_v0 = vpop.permute.xlu1 %1362  ;;  %v1724_v5 = vshll.u32 %v3857_v21, 16 }
  0xa7   : > { %1403 = vst.msk [vmem:[#allocation2 + $0x40] sm:$0xff] %vm1394_vm8, %v1363_v0  ;;  %v1347_v54 = vpop.permute.xlu0 %1346 }
  0xa8   : > { %1395 = vst.msk [vmem:[#allocation2] sm:$0xff] %vm1394_vm8, %v1347_v54  ;;  %954 = vrot.lane.b32.xlu1 %v3751_v15, %s3166_s21  ;;  %v3833_v15 = vld [vmem:[%s3220_s20 + $0xb4] sm:$0xff]  }
  0xa9   : > { %938 = vrot.lane.b32.xlu0 %v3758_v6, %s3166_s21  ;;  %v1315_v6 = vsel %vm682_vm0, %v1313_v58, %v1314_v60  ;;  %v1815_v59 = vshll.u32 %v3833_v15, 16  ;;  %v1813_v26 = vshrl.u32 %v3833_v15, 16  ;;  %v498_v60 = vshrl.u32 %v3630_v30, 16 }
  0xaa   : > { %v1365_v39 = vpop.permute.xlu1 %1364 }
  0xab   : > { %1404 = vst.msk [vmem:[#allocation2 + $0x48] sm:$0xff] %vm1394_vm8, %v1365_v39  ;;  %v1349_v45 = vpop.permute.xlu0 %1348  ;;  %v1817_v31 = vrot.slane %v1815_v59, 1  ;;  %v3878_v39 = vld [vmem:[%s3220_s20 + $0xb0] ss:$0 sps:$4 sm:$0x11]  }
  0xac   : > { %1396 = vst.msk [vmem:[#allocation2 + $0x8] sm:$0xff] %vm1394_vm8, %v1349_v45  ;;  %1257 = vrot.lane.b32.xlu1 %v1196_v28, %s3169_s24  ;;  %v1811_v28 = vsel %vm424_vm1, %v1806_v27, %v1810_v25  ;;  %v1722_v45 = vor.u32 %v1721_v34, %v1717_v17 }
  0xad   : > { %1241 = vrot.lane.b32.xlu0 %v1100_v36, %s3169_s24  ;;  %v1818_v35 = vor.u32 %v1817_v31, %v1813_v26  ;;  %v596_v36 = vshll.u32 %v3617_v22, 16  ;;  %v606_v26 = vshrl.u32 %v3642_v1, 16 }
  0xae   : > { %v1560_v51 = vpop.permute.xlu1 %1559 }
  0xaf   : > { %1600 = vst.msk [vmem:[#allocation2 + $0x40] sm:$0xff] %vm1591_vm9, %v1560_v51  ;;  %v1544_v53 = vpop.permute.xlu0 %1543  ;;  %v598_v43 = vrot.slane %v596_v36, 1 }
  0xb0   : > { %1592 = vst.msk [vmem:[#allocation2] sm:$0xff] %vm1591_vm9, %v1544_v53  ;;  %1259 = vrot.lane.b32.xlu1 %v1208_v47, %s3169_s24  ;;  %v1726_v47 = vrot.slane %v1724_v5, 1  ;;  %v1926_v53 = vrot.slane %v3842_v7, 1  ;;  %v608_v7 = vshll.u32 %v3642_v1, 16 }
  0xb1   : > { %1243 = vrot.lane.b32.xlu0 %v1112_v52, %s3169_s24  ;;  %v1949_v52 = vrot.slane %v3816_v46, 1  ;;  %v599_v63 = vor.u32 %v598_v43, %v594_v13  ;;  %v705_v13 = vrot.slane %v3911_v4, 1  ;;  %v3958_v43 = vld [vmem:[%s3220_s20 + $0x54] sm:$0xff]  }
  0xb2   : > { %v1562_v56 = vpop.permute.xlu1 %1561  ;;  %v1927_v16 = vsel %vm682_vm0, %v1925_v40, %v1926_v53  ;;  %v610_v27 = vrot.slane %v608_v7, 1  ;;  %v3948_v40 = vld [vmem:[%s3220_s20 + $0xb4] sm:$0xff]   ;;  %v3988_v7 = vld [vmem:[%s3220_s20 + $0xc8] ss:$0 sps:$4 sm:$0x11]  }
  0xb3   : > { %1601 = vst.msk [vmem:[#allocation2 + $0x48] sm:$0xff] %vm1591_vm9, %v1562_v56  ;;  %v1546_v14 = vpop.permute.xlu0 %1545  ;;  %v601_v56 = vshll.u32 %v3878_v39, 16  ;;  %v1951_v62 = vsel %vm682_vm0, %v1949_v52, %v1950_v38  ;;  %v702_v52 = vrot.slane %v3883_v49, 1 }
  0xb4   : > { %1593 = vst.msk [vmem:[#allocation2 + $0x8] sm:$0xff] %vm1591_vm9, %v1546_v14  ;;  %1370 = vrot.lane.b32.xlu1 %v1336_v12, %s3170_s25  ;;  %v1823_v12 = vsel %vm424_vm1, %v1818_v35, %v1822_v37  ;;  %v502_v14 = vrot.slane %v500_v50, 1  ;;  %v611_v34 = vor.u32 %v610_v27, %v606_v26 }
  0xb5   : > { %1354 = vrot.lane.b32.xlu0 %v1312_v57, %s3170_s25 }
  0xb6   : > { %v1865_v3 = vpop.permute.xlu1 %1864  ;;  %v503_v18 = vor.u32 %v502_v14, %v498_v60  ;;  %v3974_v14 = vld [vmem:[%s3220_s20 + $0x60] sm:$0xff]  }
  0xb7   : > { %1905 = vst.msk [vmem:[#allocation2 + $0x40] sm:$0xff] %vm1896_vm10, %v1865_v3  ;;  %v1849_v8 = vpop.permute.xlu0 %1848  ;;  %v603_v3 = vrot.slane %v601_v56, 1  ;;  %v1128_v9 = vshll.u32 %v3974_v14, 16  ;;  %v1126_v26 = vshrl.u32 %v3974_v14, 16 }
  0xb8   : > { %1897 = vst.msk [vmem:[#allocation2] sm:$0xff] %vm1896_vm10, %v1849_v8  ;;  %1372 = vrot.lane.b32.xlu1 %v1339_v61, %s3170_s25 }
  0xb9   : > { %1356 = vrot.lane.b32.xlu0 %v1315_v6, %s3170_s25  ;;  %v3906_v6 = vld [vmem:[%s3220_s20 + $0xbc] ss:$0 sps:$4 sm:$0x11]   ;;  %v604_v25 = vsel %vm424_vm1, %v599_v63, %v603_v3 }
  0xba   : > { %v1867_v19 = vpop.permute.xlu1 %1866  ;;  %v613_v29 = vshll.u32 %v3906_v6, 16 }
  0xbb   : > { %1906 = vst.msk [vmem:[#allocation2 + $0x48] sm:$0xff] %vm1896_vm10, %v1867_v19  ;;  %v1851_v24 = vpop.permute.xlu0 %1850  ;;  %v1952_v19 = vrot.slane %v3833_v15, 1 }
  0xbc   : > { %1898 = vst.msk [vmem:[#allocation2 + $0x8] sm:$0xff] %vm1896_vm10, %v1851_v24  ;;  %1567 = vrot.lane.b32.xlu1 %v3816_v46, %s3171_s26  ;;  %v1727_v46 = vsel %vm424_vm1, %v1722_v45, %v1726_v47  ;;  %v1929_v24 = vrot.slane %v3857_v21, 1  ;;  %v615_v5 = vrot.slane %v613_v29, 1  ;;  %v726_v45 = vrot.slane %v3878_v39, 1 }
  0xbd   : > { %1551 = vrot.lane.b32.xlu0 %v3819_v55, %s3171_s26  ;;  %v505_v55 = vshll.u32 %v3883_v49, 16  ;;  %v1954_v17 = vsel %vm682_vm0, %v1952_v19, %v1953_v20  ;;  %v728_v39 = vrot.slane %v3642_v1, 1  ;;  %v1212_v1 = vshll.u32 %v3948_v40, 16 }
  0xbe   : > { %v1978_v0 = vpop.permute.xlu1 %1977 }
  0xbf   : > { %2018 = vst.msk [vmem:[#allocation2 + $0x40] sm:$0xff] %vm2009_vm11, %v1978_v0  ;;  %v1962_v54 = vpop.permute.xlu0 %1961  ;;  %v507_v2 = vrot.slane %v505_v55, 1  ;;  %v3977_v55 = vld [vmem:[%s3220_s20 + $0x5c] ss:$0 sps:$4 sm:$0x11]   ;;  %v1214_v63 = vrot.slane %v1212_v1, 1 }
  0xc0   : > { %2010 = vst.msk [vmem:[#allocation2] sm:$0xff] %vm2009_vm11, %v1962_v54  ;;  %1569 = vrot.lane.b32.xlu1 %v3833_v15, %s3171_s26  ;;  %v510_v15 = vshrl.u32 %v3646_v42, 16 }
  0xc1   : > { %1553 = vrot.lane.b32.xlu0 %v3839_v10, %s3171_s26  ;;  %v508_v0 = vsel %vm424_vm1, %v503_v18, %v507_v2  ;;  %v517_v10 = vshll.u32 %v3911_v4, 16  ;;  %v1121_v2 = vshll.u32 %v3977_v55, 16  ;;  %v3993_v4 = vld [vmem:[%s3220_s20 + $0x68] ss:$0 sps:$4 sm:$0x11]  }
  0xc2   : > { %v638_v41 = vpop.permute.xlu1 %637  ;;  %v515_v35 = vor.u32 %v514_v11, %v510_v15 }
  0xc3   : > { %676 = vst.msk [vmem:[#allocation2 + $0x50] sm:$0xff] %vm665_vm4, %v638_v41  ;;  %v622_v51 = vpop.permute.xlu0 %621  ;;  %v519_v37 = vrot.slane %v517_v10, 1  ;;  %v616_v41 = vsel %vm424_vm1, %v611_v34, %v615_v5 }
  0xc4   : > { %668 = vst.msk [vmem:[#allocation2 + $0x10] sm:$0xff] %vm665_vm4, %v622_v51  ;;  %1872 = vrot.lane.b32.xlu1 %v1811_v28, %s3172_s27  ;;  %v1930_v28 = vsel %vm682_vm0, %v1928_v23, %v1929_v24  ;;  %v701_v51 = vrot.slane %v3630_v30, 1  ;;  %v729_v30 = vrot.slane %v3906_v6, 1  ;;  %v1114_v6 = vshrl.u32 %v3958_v43, 16 }
  0xc5   : > { %1856 = vrot.lane.b32.xlu0 %v1715_v44, %s3172_s27  ;;  %v725_v44 = vrot.slane %v3617_v22, 1  ;;  %v520_v50 = vsel %vm424_vm1, %v515_v35, %v519_v37  ;;  %v1340_v35 = vrot.slane %v3948_v40, 1 }
  0xc6   : > { %v1980_v57 = vpop.permute.xlu1 %1979  ;;  %v2034_v58 = vld [vmem:[#allocation2 + $0x40] sm:$0xff]  ;;  %v703_v53 = vsel %vm682_vm0, %v701_v51, %v702_v52  ;;  %v1344_v52 = vrot.slane %v3988_v7, 1 }
  0xc7   : > { %2019 = vst.msk [vmem:[#allocation2 + $0x48] sm:$0xff] %vm2009_vm11, %v1980_v57  ;;  %v1964_v48 = vpop.permute.xlu0 %1963  ;;  %v2026_v61 = vld [vmem:[#allocation2] sm:$0xff]  ;;  %2844 = vmatprep.mubr.bf16.mxu1 %v2034_v58  ;;  %v727_v22 = vsel %vm682_vm0, %v725_v44, %v726_v45  ;;  %v730_v57 = vsel %vm682_vm0, %v728_v39, %v729_v30  ;;  %v1316_v44 = vrot.slane %v3958_v43, 1  ;;  %v1317_v45 = vrot.slane %v3977_v55, 1 }
  0xc8   : > { %2011 = vst.msk [vmem:[#allocation2 + $0x8] sm:$0xff] %vm2009_vm11, %v1964_v48  ;;  %2828 = vmatprep.mubr.bf16.mxu0 %v2026_v61  ;;  %1874 = vrot.lane.b32.xlu1 %v1823_v12, %s3172_s27  ;;  %v704_v12 = vrot.slane %v3646_v42, 1  ;;  %v3967_v58 = vld [vmem:[%s3220_s20 + $0xc0] sm:$0xff]   ;;  %v3970_v42 = vld [vmem:[%s3220_s20 + $0xbc] ss:$0 sps:$4 sm:$0x11]  }
  0xc9   : > { %1858 = vrot.lane.b32.xlu0 %v1727_v46, %s3172_s27  ;;  %v1116_v48 = vshll.u32 %v3958_v43, 16  ;;  %v1217_v3 = vshll.u32 %v3970_v42, 16  ;;  %v1222_v20 = vshrl.u32 %v3967_v58, 16  ;;  %v1341_v37 = vrot.slane %v3970_v42, 1 }
  0xca   : > { %v640_v8 = vpop.permute.xlu1 %639  ;;  %v706_v60 = vsel %vm682_vm0, %v704_v12, %v705_v13  ;;  %v1343_v51 = vrot.slane %v3967_v58, 1  ;;  %v1319_v39 = vrot.slane %v3974_v14, 1  ;;  %v1320_v30 = vrot.slane %v3993_v4, 1  ;;  %v4046_v13 = vld [vmem:[%s3220_s20 + $0xcc] sm:$0xff]  }
  0xcb   : > { %677 = vst.msk [vmem:[#allocation2 + $0x58] sm:$0xff] %vm665_vm4, %v640_v8  ;;  %v624_v59 = vpop.permute.xlu0 %623  ;;  %v1224_v8 = vshll.u32 %v3967_v58, 16  ;;  %v1118_v18 = vrot.slane %v1116_v48, 1  ;;  %v1219_v23 = vrot.slane %v1217_v3, 1 }
  0xcc   : > { %669 = vst.msk [vmem:[#allocation2 + $0x18] sm:$0xff] %vm665_vm4, %v624_v59  ;;  %1985 = vrot.lane.b32.xlu1 %v1951_v62, %s3173_s28  ;;  %v1210_v62 = vshrl.u32 %v3948_v40, 16  ;;  %v1345_v12 = vsel %vm682_vm0, %v1343_v51, %v1344_v52  ;;  %v4057_v42 = vld [vmem:[%s3220_s20 + $0x68] ss:$0 sps:$4 sm:$0x11]  }
  0xcd   : > { %1969 = vrot.lane.b32.xlu0 %v1927_v16, %s3173_s28  ;;  %v1226_v24 = vrot.slane %v1224_v8, 1  ;;  %v1119_v29 = vor.u32 %v1118_v18, %v1114_v6  ;;  %v4073_v8 = vld [vmem:[%s3220_s20 + $0x74] ss:$0 sps:$4 sm:$0x11]  }
  0xce   : > { %v752_v31 = vpop.permute.xlu1 %751  ;;  %v2035_v32 = vld [vmem:[#allocation2 + $0x48] sm:$0xff]  ;;  %v1215_v19 = vor.u32 %v1214_v63, %v1210_v62  ;;  %v4068_v62 = vld [vmem:[%s3220_s20 + $0xd4] ss:$0 sps:$4 sm:$0x11]   ;;  %v1839_v63 = vshll.u32 %v4046_v13, 16 }
  0xcf   : > { %790 = vst.msk [vmem:[#allocation2 + $0x50] sm:$0xff] %vm779_vm5, %v752_v31  ;;  %v736_v21 = vpop.permute.xlu0 %735  ;;  %v2027_v33 = vld [vmem:[#allocation2 + $0x8] sm:$0xff]  ;;  %2845 = vmatmul.mubr.bf16.vlgmr.msra.gmra.mrb[0].mxu1 %v2035_v32  ;;  %v1123_v31 = vrot.slane %v1121_v2, 1  ;;  %v1130_v32 = vrot.slane %v1128_v9, 1  ;;  %v1227_v10 = vor.u32 %v1226_v24, %v1222_v20  ;;  %v1837_v2 = vshrl.u32 %v4046_v13, 16 }
  0xd0   : > { %782 = vst.msk [vmem:[#allocation2 + $0x10] sm:$0xff] %vm779_vm5, %v736_v21  ;;  %2829 = vmatmul.mubr.bf16.vlgmr.msra.gmra.mrb[0].mxu0 %v2027_v33  ;;  %645 = vrot.lane.b32.xlu1 %v604_v25, %s3168_s23  ;;  %v1229_v25 = vshll.u32 %v3988_v7, 16  ;;  %v1220_v11 = vsel %vm424_vm1, %v1215_v19, %v1219_v23  ;;  %v1736_v7 = vshll.u32 %v4057_v42, 16  ;;  %v1841_v19 = vrot.slane %v1839_v63, 1 }
  0xd1   : > { %629 = vrot.lane.b32.xlu0 %v508_v0, %s3168_s23  ;;  %v1133_v0 = vshll.u32 %v3993_v4, 16  ;;  %v1131_v34 = vor.u32 %v1130_v32, %v1126_v26  ;;  %v1844_v20 = vshll.u32 %v4068_v62, 16 }
  0xd2   : > { %v754_v54 = vpop.permute.xlu1 %753  ;;  %v1231_v21 = vrot.slane %v1229_v25, 1  ;;  %v1738_v25 = vrot.slane %v1736_v7, 1  ;;  %v1842_v32 = vor.u32 %v1841_v19, %v1837_v2 }
  0xd3   : > { %791 = vst.msk [vmem:[#allocation2 + $0x58] sm:$0xff] %vm779_vm5, %v754_v54  ;;  %v738_v36 = vpop.permute.xlu0 %737  ;;  %v1135_v5 = vrot.slane %v1133_v0, 1  ;;  %v1846_v0 = vrot.slane %v1844_v20, 1 }
  0xd4   : > { %783 = vst.msk [vmem:[#allocation2 + $0x18] sm:$0xff] %vm779_vm5, %v738_v36  ;;  %1987 = vrot.lane.b32.xlu1 %v1954_v17, %s3173_s28  ;;  %v1124_v17 = vsel %vm424_vm1, %v1119_v29, %v1123_v31 }
  0xd5   : > { %1971 = vrot.lane.b32.xlu0 %v1930_v28, %s3173_s28  ;;  %v1232_v28 = vsel %vm424_vm1, %v1227_v10, %v1231_v21 }
  0xd6   : > { %v949_v47 = vpop.permute.xlu1 %948 }
  0xd7   : > { %987 = vst.msk [vmem:[#allocation2 + $0x50] sm:$0xff] %vm976_vm6, %v949_v47  ;;  %v933_v38 = vpop.permute.xlu0 %932 }
  0xd8   : > { %979 = vst.msk [vmem:[#allocation2 + $0x10] sm:$0xff] %vm976_vm6, %v933_v38  ;;  %647 = vrot.lane.b32.xlu1 %v616_v41, %s3168_s23  ;;  %v1136_v41 = vsel %vm424_vm1, %v1131_v34, %v1135_v5  ;;  %v4032_v38 = vld [vmem:[%s3220_s20 + $0xc0] sm:$0xff]  }
  0xd9   : > { %631 = vrot.lane.b32.xlu0 %v520_v50, %s3168_s23  ;;  %v1342_v50 = vsel %vm682_vm0, %v1340_v35, %v1341_v37  ;;  %v1955_v34 = vrot.slane %v4032_v38, 1 }
  0xda   : > { %v951_v49 = vpop.permute.xlu1 %950 }
  0xdb   : > { %988 = vst.msk [vmem:[#allocation2 + $0x58] sm:$0xff] %vm976_vm6, %v951_v49  ;;  %v935_v56 = vpop.permute.xlu0 %934  ;;  %v4038_v49 = vld [vmem:[%s3220_s20 + $0x60] sm:$0xff]  }
  0xdc   : > { %980 = vst.msk [vmem:[#allocation2 + $0x18] sm:$0xff] %vm976_vm6, %v935_v56  ;;  %759 = vrot.lane.b32.xlu1 %v727_v22, %s3167_s22  ;;  %v1318_v22 = vsel %vm682_vm0, %v1316_v44, %v1317_v45  ;;  %v1827_v56 = vshll.u32 %v4032_v38, 16  ;;  %v1729_v55 = vshrl.u32 %v4038_v49, 16  ;;  %v1931_v37 = vrot.slane %v4038_v49, 1 }
  0xdd   : > { %743 = vrot.lane.b32.xlu0 %v703_v53, %s3167_s22 }
  0xde   : > { %v1254_v46 = vpop.permute.xlu1 %1253  ;;  %v1829_v48 = vrot.slane %v1827_v56, 1 }
  0xdf   : > { %1292 = vst.msk [vmem:[#allocation2 + $0x50] sm:$0xff] %vm1281_vm7, %v1254_v46  ;;  %v1238_v61 = vpop.permute.xlu0 %1237  ;;  %v1731_v46 = vshll.u32 %v4038_v49, 16 }
  0xe0   : > { %1284 = vst.msk [vmem:[#allocation2 + $0x10] sm:$0xff] %vm1281_vm7, %v1238_v61  ;;  %761 = vrot.lane.b32.xlu1 %v730_v57, %s3167_s22  ;;  %v1321_v57 = vsel %vm682_vm0, %v1319_v39, %v1320_v30 }
  0xe1   : > { %745 = vrot.lane.b32.xlu0 %v706_v60, %s3167_s22  ;;  %v1733_v6 = vrot.slane %v1731_v46, 1  ;;  %s2583_s22 = sshll.u32 %s3156_s12, 5 }
  0xe2   : > { %v1256_v16 = vpop.permute.xlu1 %1255  ;;  %p183_p5 = scmp.lt.s32.totalorder %s2583_s22, 63 }
  0xe3   : > { %1293 = vst.msk [vmem:[#allocation2 + $0x58] sm:$0xff] %vm1281_vm7, %v1256_v16  ;;  %v1240_v59 = vpop.permute.xlu0 %1239  ;;  %v1734_v24 = vor.u32 %v1733_v6, %v1729_v55 }
  0xe4   : > { %1285 = vst.msk [vmem:[#allocation2 + $0x18] sm:$0xff] %vm1281_vm7, %v1240_v59  ;;  %956 = vrot.lane.b32.xlu1 %v3948_v40, %s3166_s21  ;;  %s4399_s22 = smov (!%p183_p5, %s2583_s22), 63 }
  0xe5   : > { %940 = vrot.lane.b32.xlu0 %v3958_v43, %s3166_s21  ;;  %v4049_v43 = vld [vmem:[%s3220_s20 + $0xc8] ss:$0 sps:$4 sm:$0x11]   ;;  %s2584_s12 = sshll.u32 %s4399_s22, 3 }
  0xe6   : > { %v1367_v27 = vpop.permute.xlu1 %1366  ;;  %v1832_v61 = vshll.u32 %v4049_v43, 16  ;;  %v1956_v5 = vrot.slane %v4049_v43, 1 }
  0xe7   : > { %1405 = vst.msk [vmem:[#allocation2 + $0x50] sm:$0xff] %vm1394_vm8, %v1367_v27  ;;  %v1351_v15 = vpop.permute.xlu0 %1350  ;;  %v1748_v27 = vshll.u32 %v4073_v8, 16 }
  0xe8   : > { %1397 = vst.msk [vmem:[#allocation2 + $0x10] sm:$0xff] %vm1394_vm8, %v1351_v15  ;;  %958 = vrot.lane.b32.xlu1 %v3967_v58, %s3166_s21  ;;  %v4054_v58 = vld [vmem:[%s3220_s20 + $0x6c] sm:$0xff]   ;;  %v1834_v59 = vrot.slane %v1832_v61, 1  ;;  %v1957_v45 = vsel %vm682_vm0, %v1955_v34, %v1956_v5 }
  0xe9   : > { %942 = vrot.lane.b32.xlu0 %v3974_v14, %s3166_s21  ;;  %v1825_v14 = vshrl.u32 %v4032_v38, 16  ;;  %v1743_v16 = vshll.u32 %v4054_v58, 16  ;;  %v1741_v4 = vshrl.u32 %v4054_v58, 16  ;;  %v1750_v21 = vrot.slane %v1748_v27, 1 }
  0xea   : > { %v1369_v33 = vpop.permute.xlu1 %1368 }
  0xeb   : > { %1406 = vst.msk [vmem:[#allocation2 + $0x58] sm:$0xff] %vm1394_vm8, %v1369_v33  ;;  %v1353_v54 = vpop.permute.xlu0 %1352  ;;  %v1830_v9 = vor.u32 %v1829_v48, %v1825_v14  ;;  %v1745_v26 = vrot.slane %v1743_v16, 1 }
  0xec   : > { %1398 = vst.msk [vmem:[#allocation2 + $0x18] sm:$0xff] %vm1394_vm8, %v1353_v54  ;;  %1261 = vrot.lane.b32.xlu1 %v1220_v11, %s3169_s24  ;;  %v1739_v11 = vsel %vm424_vm1, %v1734_v24, %v1738_v25 }
  0xed   : > { %1245 = vrot.lane.b32.xlu0 %v1124_v17, %s3169_s24  ;;  %v1835_v31 = vsel %vm424_vm1, %v1830_v9, %v1834_v59  ;;  %v1746_v10 = vor.u32 %v1745_v26, %v1741_v4  ;;  %v1847_v17 = vsel %vm424_vm1, %v1842_v32, %v1846_v0 }
  0xee   : > { %v1564_v36 = vpop.permute.xlu1 %1563 }
  0xef   : > { %1602 = vst.msk [vmem:[#allocation2 + $0x50] sm:$0xff] %vm1591_vm9, %v1564_v36  ;;  %v1548_v47 = vpop.permute.xlu0 %1547  ;;  %v1751_v35 = vsel %vm424_vm1, %v1746_v10, %v1750_v21  ;;  %v1932_v36 = vrot.slane %v4057_v42, 1 }
  0xf0   : > { %1594 = vst.msk [vmem:[#allocation2 + $0x10] sm:$0xff] %vm1591_vm9, %v1548_v47  ;;  %1263 = vrot.lane.b32.xlu1 %v1232_v28, %s3169_s24  ;;  %v1958_v47 = vrot.slane %v4046_v13, 1 }
  0xf1   : > { %1247 = vrot.lane.b32.xlu0 %v1136_v41, %s3169_s24  ;;  %v1933_v52 = vsel %vm682_vm0, %v1931_v37, %v1932_v36 }
  0xf2   : > { %v1566_v40 = vpop.permute.xlu1 %1565 }
  0xf3   : > { %1603 = vst.msk [vmem:[#allocation2 + $0x58] sm:$0xff] %vm1591_vm9, %v1566_v40  ;;  %v1550_v53 = vpop.permute.xlu0 %1549  ;;  %v1935_v40 = vrot.slane %v4073_v8, 1 }
  0xf4   : > { %1595 = vst.msk [vmem:[#allocation2 + $0x18] sm:$0xff] %vm1591_vm9, %v1550_v53  ;;  %1374 = vrot.lane.b32.xlu1 %v1342_v50, %s3170_s25  ;;  %v1959_v50 = vrot.slane %v4068_v62, 1 }
  0xf5   : > { %1358 = vrot.lane.b32.xlu0 %v1318_v22, %s3170_s25 }
  0xf6   : > { %v1869_v1 = vpop.permute.xlu1 %1868  ;;  %v1960_v39 = vsel %vm682_vm0, %v1958_v47, %v1959_v50 }
  0xf7   : > { %1907 = vst.msk [vmem:[#allocation2 + $0x50] sm:$0xff] %vm1896_vm10, %v1869_v1  ;;  %v1853_v60 = vpop.permute.xlu0 %1852 }
  0xf8   : > { %1899 = vst.msk [vmem:[#allocation2 + $0x10] sm:$0xff] %vm1896_vm10, %v1853_v60  ;;  %1376 = vrot.lane.b32.xlu1 %v1345_v12, %s3170_s25 }
  0xf9   : > { %1360 = vrot.lane.b32.xlu0 %v1321_v57, %s3170_s25  ;;  %s4223_s25 = scalar_lea.vmem %s4393_s3, %s2584_s12 }
  0xfa   : > { %v1871_v3 = vpop.permute.xlu1 %1870 }
  0xfb   : > { %1908 = vst.msk [vmem:[#allocation2 + $0x58] sm:$0xff] %vm1896_vm10, %v1871_v3  ;;  %v1855_v18 = vpop.permute.xlu0 %1854 }
  0xfc   : > { %1900 = vst.msk [vmem:[#allocation2 + $0x18] sm:$0xff] %vm1896_vm10, %v1855_v18  ;;  %1571 = vrot.lane.b32.xlu1 %v4032_v38, %s3171_s26  ;;  %v1934_v38 = vrot.slane %v4054_v58, 1 }
  0xfd   : > { %1555 = vrot.lane.b32.xlu0 %v4038_v49, %s3171_s26 }
  0xfe   : > { %v1982_v23 = vpop.permute.xlu1 %1981  ;;  %v1936_v53 = vsel %vm682_vm0, %v1934_v38, %v1935_v40 }
  0xff   : > { %2020 = vst.msk [vmem:[#allocation2 + $0x50] sm:$0xff] %vm2009_vm11, %v1982_v23  ;;  %v1966_v29 = vpop.permute.xlu0 %1965 }
 0x100   : > { %2012 = vst.msk [vmem:[#allocation2 + $0x10] sm:$0xff] %vm2009_vm11, %v1966_v29  ;;  %1573 = vrot.lane.b32.xlu1 %v4046_v13, %s3171_s26 }
 0x101   : > { %1557 = vrot.lane.b32.xlu0 %v4054_v58, %s3171_s26 }
 0x102   : > { %v642_v15 = vpop.permute.xlu1 %641 }
 0x103   : > { %678 = vst.msk [vmem:[#allocation2 + $0x60] sm:$0xff] %vm665_vm4, %v642_v15  ;;  %v626_v33 = vpop.permute.xlu0 %625 }
 0x104   : > { %670 = vst.msk [vmem:[#allocation2 + $0x20] sm:$0xff] %vm665_vm4, %v626_v33  ;;  %1876 = vrot.lane.b32.xlu1 %v1835_v31, %s3172_s27 }
 0x105   : > { %1860 = vrot.lane.b32.xlu0 %v1739_v11, %s3172_s27 }
 0x106   : > { %v1984_v54 = vpop.permute.xlu1 %1983  ;;  %v2036_v28 = vld [vmem:[#allocation2 + $0x50] sm:$0xff] }
 0x107   : > { %2021 = vst.msk [vmem:[#allocation2 + $0x58] sm:$0xff] %vm2009_vm11, %v1984_v54  ;;  %v1968_v41 = vpop.permute.xlu0 %1967  ;;  %v2028_v44 = vld [vmem:[#allocation2 + $0x10] sm:$0xff]  ;;  %2848 = vmatprep.mubr.bf16.mxu1 %v2036_v28 }
 0x108   : > { %2013 = vst.msk [vmem:[#allocation2 + $0x18] sm:$0xff] %vm2009_vm11, %v1968_v41  ;;  %2832 = vmatprep.mubr.bf16.mxu0 %v2028_v44  ;;  %1878 = vrot.lane.b32.xlu1 %v1847_v17, %s3172_s27 }
 0x109   : > { %1862 = vrot.lane.b32.xlu0 %v1751_v35, %s3172_s27 }
 0x10a   : > { %v644_v51 = vpop.permute.xlu1 %643 }
 0x10b   : > { %679 = vst.msk [vmem:[#allocation2 + $0x68] sm:$0xff] %vm665_vm4, %v644_v51  ;;  %v628_v22 = vpop.permute.xlu0 %627 }
 0x10c   : > { %671 = vst.msk [vmem:[#allocation2 + $0x28] sm:$0xff] %vm665_vm4, %v628_v22  ;;  %1989 = vrot.lane.b32.xlu1 %v1957_v45, %s3173_s28 }
 0x10d   : > { %1973 = vrot.lane.b32.xlu0 %v1933_v52, %s3173_s28 }
 0x10e   : > { %v756_v30 = vpop.permute.xlu1 %755  ;;  %v2037_v49 = vld [vmem:[#allocation2 + $0x58] sm:$0xff] }
 0x10f   : > { %792 = vst.msk [vmem:[#allocation2 + $0x60] sm:$0xff] %vm779_vm5, %v756_v30  ;;  %v740_v12 = vpop.permute.xlu0 %739  ;;  %v2029_v13 = vld [vmem:[#allocation2 + $0x18] sm:$0xff]  ;;  %2849 = vmatmul.mubr.bf16.gmra.mrb[4].mxu1 %v2037_v49 }
 0x110   : > { %784 = vst.msk [vmem:[#allocation2 + $0x20] sm:$0xff] %vm779_vm5, %v740_v12  ;;  %2833 = vmatmul.mubr.bf16.gmra.mrb[4].mxu0 %v2029_v13  ;;  %1991 = vrot.lane.b32.xlu1 %v1960_v39, %s3173_s28 }
 0x111   : > { %1975 = vrot.lane.b32.xlu0 %v1936_v53, %s3173_s28 }
 0x112   : > { %v758_v43 = vpop.permute.xlu1 %757 }
 0x113   : > { %793 = vst.msk [vmem:[#allocation2 + $0x68] sm:$0xff] %vm779_vm5, %v758_v43  ;;  %v742_v56 = vpop.permute.xlu0 %741 }
 0x114   : > { %785 = vst.msk [vmem:[#allocation2 + $0x28] sm:$0xff] %vm779_vm5, %v742_v56 }
 0x116   : > { %v953_v1 = vpop.permute.xlu1 %952 }
 0x117   : > { %989 = vst.msk [vmem:[#allocation2 + $0x60] sm:$0xff] %vm976_vm6, %v953_v1  ;;  %v937_v57 = vpop.permute.xlu0 %936  ;;  %v4185_v1 = vld [vmem:[%s4392_s2] ss:$0 sm:$0xff] }
 0x118   : > { %981 = vst.msk [vmem:[#allocation2 + $0x20] sm:$0xff] %vm976_vm6, %v937_v57 }
 0x11a   : > { %v955_v58 = vpop.permute.xlu1 %954 }
 0x11b   : > { %990 = vst.msk [vmem:[#allocation2 + $0x68] sm:$0xff] %vm976_vm6, %v955_v58  ;;  %v939_v42 = vpop.permute.xlu0 %938 }
 0x11c   : > { %982 = vst.msk [vmem:[#allocation2 + $0x28] sm:$0xff] %vm976_vm6, %v939_v42 }
 0x11e   : > { %v1258_v46 = vpop.permute.xlu1 %1257 }
 0x11f   : > { %1294 = vst.msk [vmem:[#allocation2 + $0x60] sm:$0xff] %vm1281_vm7, %v1258_v46  ;;  %v1242_v60 = vpop.permute.xlu0 %1241 }
 0x120   : > { %1286 = vst.msk [vmem:[#allocation2 + $0x20] sm:$0xff] %vm1281_vm7, %v1242_v60 }
 0x122   : > { %v1260_v14 = vpop.permute.xlu1 %1259 }
 0x123   : > { %1295 = vst.msk [vmem:[#allocation2 + $0x68] sm:$0xff] %vm1281_vm7, %v1260_v14  ;;  %v1244_v55 = vpop.permute.xlu0 %1243 }
 0x124   : > { %1287 = vst.msk [vmem:[#allocation2 + $0x28] sm:$0xff] %vm1281_vm7, %v1244_v55 }
 0x126   : > { %v1371_v48 = vpop.permute.xlu1 %1370 }
 0x127   : > { %1407 = vst.msk [vmem:[#allocation2 + $0x60] sm:$0xff] %vm1394_vm8, %v1371_v48  ;;  %v1355_v61 = vpop.permute.xlu0 %1354 }
 0x128   : > { %1399 = vst.msk [vmem:[#allocation2 + $0x20] sm:$0xff] %vm1394_vm8, %v1355_v61 }
 0x12a   : > { %v1373_v62 = vpop.permute.xlu1 %1372 }
 0x12b   : > { %1408 = vst.msk [vmem:[#allocation2 + $0x68] sm:$0xff] %vm1394_vm8, %v1373_v62  ;;  %v1357_v63 = vpop.permute.xlu0 %1356 }
 0x12c   : > { %1400 = vst.msk [vmem:[#allocation2 + $0x28] sm:$0xff] %vm1394_vm8, %v1357_v63 }
 0x12e   : > { %v1568_v3 = vpop.permute.xlu1 %1567 }
 0x12f   : > { %1604 = vst.msk [vmem:[#allocation2 + $0x60] sm:$0xff] %vm1591_vm9, %v1568_v3  ;;  %v1552_v6 = vpop.permute.xlu0 %1551 }
 0x130   : > { %1596 = vst.msk [vmem:[#allocation2 + $0x20] sm:$0xff] %vm1591_vm9, %v1552_v6 }
 0x132   : > { %v1570_v7 = vpop.permute.xlu1 %1569 }
 0x133   : > { %1605 = vst.msk [vmem:[#allocation2 + $0x68] sm:$0xff] %vm1591_vm9, %v1570_v7  ;;  %v1554_v8 = vpop.permute.xlu0 %1553 }
 0x134   : > { %1597 = vst.msk [vmem:[#allocation2 + $0x28] sm:$0xff] %vm1591_vm9, %v1554_v8 }
 0x136   : > { %v1873_v16 = vpop.permute.xlu1 %1872 }
 0x137   : > { %1909 = vst.msk [vmem:[#allocation2 + $0x60] sm:$0xff] %vm1896_vm10, %v1873_v16  ;;  %v1857_v18 = vpop.permute.xlu0 %1856 }
 0x138   : > { %1901 = vst.msk [vmem:[#allocation2 + $0x20] sm:$0xff] %vm1896_vm10, %v1857_v18 }
 0x13a   : > { %v1875_v2 = vpop.permute.xlu1 %1874 }
 0x13b   : > { %1910 = vst.msk [vmem:[#allocation2 + $0x68] sm:$0xff] %vm1896_vm10, %v1875_v2  ;;  %v1859_v4 = vpop.permute.xlu0 %1858 }
 0x13c   : > { %1902 = vst.msk [vmem:[#allocation2 + $0x28] sm:$0xff] %vm1896_vm10, %v1859_v4 }
 0x13e   : > { %v1986_v9 = vpop.permute.xlu1 %1985 }
 0x13f   : > { %2022 = vst.msk [vmem:[#allocation2 + $0x60] sm:$0xff] %vm2009_vm11, %v1986_v9  ;;  %v1970_v59 = vpop.permute.xlu0 %1969 }
 0x140   : > { %2014 = vst.msk [vmem:[#allocation2 + $0x20] sm:$0xff] %vm2009_vm11, %v1970_v59 }
 0x142   : > { %v646_v19 = vpop.permute.xlu1 %645 }
 0x143   : > { %680 = vst.msk [vmem:[#allocation2 + $0x70] sm:$0xff] %vm665_vm4, %v646_v19  ;;  %v630_v20 = vpop.permute.xlu0 %629 }
 0x144   : > { %672 = vst.msk [vmem:[#allocation2 + $0x30] sm:$0xff] %vm665_vm4, %v630_v20 }
 0x146   : > { %v1988_v23 = vpop.permute.xlu1 %1987  ;;  %v2038_v24 = vld [vmem:[#allocation2 + $0x60] sm:$0xff] }
 0x147   : > { %2023 = vst.msk [vmem:[#allocation2 + $0x68] sm:$0xff] %vm2009_vm11, %v1988_v23  ;;  %v1972_v25 = vpop.permute.xlu0 %1971  ;;  %v2030_v26 = vld [vmem:[#allocation2 + $0x20] sm:$0xff]  ;;  %2852 = vmatprep.mubr.bf16.mxu1 %v2038_v24 }
 0x148   : > { %2015 = vst.msk [vmem:[#allocation2 + $0x28] sm:$0xff] %vm2009_vm11, %v1972_v25  ;;  %2836 = vmatprep.mubr.bf16.mxu0 %v2030_v26 }
 0x14a   : > { %v648_v27 = vpop.permute.xlu1 %647 }
 0x14b   : > { %681 = vst.msk [vmem:[#allocation2 + $0x78] sm:$0xff] %vm665_vm4, %v648_v27  ;;  %v632_v29 = vpop.permute.xlu0 %631 }
 0x14c   : > { %673 = vst.msk [vmem:[#allocation2 + $0x38] sm:$0xff] %vm665_vm4, %v632_v29 }
 0x14e   : > { %v760_v31 = vpop.permute.xlu1 %759  ;;  %v2039_v32 = vld [vmem:[#allocation2 + $0x68] sm:$0xff] }
 0x14f   : > { %794 = vst.msk [vmem:[#allocation2 + $0x70] sm:$0xff] %vm779_vm5, %v760_v31  ;;  %v744_v0 = vpop.permute.xlu0 %743  ;;  %v2031_v15 = vld [vmem:[#allocation2 + $0x28] sm:$0xff]  ;;  %2853 = vmatmul.mubr.bf16.gmra.mrb[8].mxu1 %v2039_v32 }
 0x150   : > { %786 = vst.msk [vmem:[#allocation2 + $0x30] sm:$0xff] %vm779_vm5, %v744_v0  ;;  %2837 = vmatmul.mubr.bf16.gmra.mrb[8].mxu0 %v2031_v15 }
 0x152   : > { %v762_v11 = vpop.permute.xlu1 %761 }
 0x153   : > { %795 = vst.msk [vmem:[#allocation2 + $0x78] sm:$0xff] %vm779_vm5, %v762_v11  ;;  %v746_v10 = vpop.permute.xlu0 %745 }
 0x154   : > { %787 = vst.msk [vmem:[#allocation2 + $0x38] sm:$0xff] %vm779_vm5, %v746_v10 }
 0x156   : > { %v957_v21 = vpop.permute.xlu1 %956 }
 0x157   : > { %991 = vst.msk [vmem:[#allocation2 + $0x70] sm:$0xff] %vm976_vm6, %v957_v21  ;;  %v941_v33 = vpop.permute.xlu0 %940 }
 0x158   : > { %983 = vst.msk [vmem:[#allocation2 + $0x30] sm:$0xff] %vm976_vm6, %v941_v33 }
 0x15a   : > { %v959_v17 = vpop.permute.xlu1 %958 }
 0x15b   : > { %992 = vst.msk [vmem:[#allocation2 + $0x78] sm:$0xff] %vm976_vm6, %v959_v17  ;;  %v943_v34 = vpop.permute.xlu0 %942 }
 0x15c   : > { %984 = vst.msk [vmem:[#allocation2 + $0x38] sm:$0xff] %vm976_vm6, %v943_v34 }
 0x15e   : > { %v1262_v5 = vpop.permute.xlu1 %1261 }
 0x15f   : > { %1296 = vst.msk [vmem:[#allocation2 + $0x70] sm:$0xff] %vm1281_vm7, %v1262_v5  ;;  %v1246_v54 = vpop.permute.xlu0 %1245 }
 0x160   : > { %1288 = vst.msk [vmem:[#allocation2 + $0x30] sm:$0xff] %vm1281_vm7, %v1246_v54 }
 0x162   : > { %v1264_v28 = vpop.permute.xlu1 %1263 }
 0x163   : > { %1297 = vst.msk [vmem:[#allocation2 + $0x78] sm:$0xff] %vm1281_vm7, %v1264_v28  ;;  %v1248_v35 = vpop.permute.xlu0 %1247 }
 0x164   : > { %1289 = vst.msk [vmem:[#allocation2 + $0x38] sm:$0xff] %vm1281_vm7, %v1248_v35 }
 0x166   : > { %v1375_v37 = vpop.permute.xlu1 %1374 }
 0x167   : > { %1409 = vst.msk [vmem:[#allocation2 + $0x70] sm:$0xff] %vm1394_vm8, %v1375_v37  ;;  %v1359_v36 = vpop.permute.xlu0 %1358 }
 0x168   : > { %1401 = vst.msk [vmem:[#allocation2 + $0x30] sm:$0xff] %vm1394_vm8, %v1359_v36 }
 0x16a   : > { %v1377_v41 = vpop.permute.xlu1 %1376 }
 0x16b   : > { %1410 = vst.msk [vmem:[#allocation2 + $0x78] sm:$0xff] %vm1394_vm8, %v1377_v41  ;;  %v1361_v44 = vpop.permute.xlu0 %1360 }
 0x16c   : > { %1402 = vst.msk [vmem:[#allocation2 + $0x38] sm:$0xff] %vm1394_vm8, %v1361_v44 }
 0x16e   : > { %v1572_v45 = vpop.permute.xlu1 %1571 }
 0x16f   : > { %1606 = vst.msk [vmem:[#allocation2 + $0x70] sm:$0xff] %vm1591_vm9, %v1572_v45  ;;  %v1556_v47 = vpop.permute.xlu0 %1555 }
 0x170   : > { %1598 = vst.msk [vmem:[#allocation2 + $0x30] sm:$0xff] %vm1591_vm9, %v1556_v47 }
 0x172   : > { %v1574_v50 = vpop.permute.xlu1 %1573 }
 0x173   : > { %1607 = vst.msk [vmem:[#allocation2 + $0x78] sm:$0xff] %vm1591_vm9, %v1574_v50  ;;  %v1558_v51 = vpop.permute.xlu0 %1557 }
 0x174   : > { %1599 = vst.msk [vmem:[#allocation2 + $0x38] sm:$0xff] %vm1591_vm9, %v1558_v51 }
 0x176   : > { %v1877_v52 = vpop.permute.xlu1 %1876 }
 0x177   : > { %1911 = vst.msk [vmem:[#allocation2 + $0x70] sm:$0xff] %vm1896_vm10, %v1877_v52  ;;  %v1861_v38 = vpop.permute.xlu0 %1860 }
 0x178   : > { %1903 = vst.msk [vmem:[#allocation2 + $0x30] sm:$0xff] %vm1896_vm10, %v1861_v38 }
 0x17a   : > { %v1879_v40 = vpop.permute.xlu1 %1878 }
 0x17b   : > { %1912 = vst.msk [vmem:[#allocation2 + $0x78] sm:$0xff] %vm1896_vm10, %v1879_v40  ;;  %v1863_v22 = vpop.permute.xlu0 %1862 }
 0x17c   : > { %1904 = vst.msk [vmem:[#allocation2 + $0x38] sm:$0xff] %vm1896_vm10, %v1863_v22 }
 0x17e   : > { %v1990_v39 = vpop.permute.xlu1 %1989 }
 0x17f   : > { %2024 = vst.msk [vmem:[#allocation2 + $0x70] sm:$0xff] %vm2009_vm11, %v1990_v39  ;;  %v1974_v30 = vpop.permute.xlu0 %1973 }
 0x180   : > { %2016 = vst.msk [vmem:[#allocation2 + $0x30] sm:$0xff] %vm2009_vm11, %v1974_v30 }
 0x182   : > { %v1992_v49 = vpop.permute.xlu1 %1991 }
 0x183   : > { %2025 = vst.msk [vmem:[#allocation2 + $0x78] sm:$0xff] %vm2009_vm11, %v1992_v49  ;;  %v1976_v53 = vpop.permute.xlu0 %1975 }
 0x184   : > { %2017 = vst.msk [vmem:[#allocation2 + $0x38] sm:$0xff] %vm2009_vm11, %v1976_v53 }
 0x186   : > { %v2040_v12 = vld [vmem:[#allocation2 + $0x70] sm:$0xff] }
 0x187   : > { %v2032_v13 = vld [vmem:[#allocation2 + $0x30] sm:$0xff]  ;;  %2856 = vmatprep.mubr.bf16.mxu1 %v2040_v12 }
 0x188   : > { %2840 = vmatprep.mubr.bf16.mxu0 %v2032_v13 }
 0x18a   : > { %v2041_v43 = vld [vmem:[#allocation2 + $0x78] sm:$0xff] }
 0x18b   : > { %v2033_v56 = vld [vmem:[#allocation2 + $0x38] sm:$0xff]  ;;  %2857 = vmatmul.mubr.bf16.gmra.mrb[12].mxu1 %v2041_v43 }
 0x18c   : > { %2841 = vmatmul.mubr.bf16.gmra.mrb[12].mxu0 %v2033_v56 }
 0x1a2   : > { %v2846_v57 = vpop.f32.mrb[0].mxu1 }
 0x1a3   : > { %v2830_v58 = vpop.f32.mrb[0].mxu0  ;;  %v4188_v42 = vadd.f32 %v2846_v57, %v4185_v1  ;;  %v2211_v46 = vpop.f32.mrb[1].mxu1 }
 0x1a4   : > { %v4191_v60 = vadd.f32 %v2830_v58, %v4185_v1  ;;  %v2147_v14 = vpop.f32.mrb[1].mxu0  ;;  %v4194_v55 = vadd.f32 %v4185_v1, %v2211_v46  ;;  %v2847_v48 = vpop.f32.mrb[2].mxu1 }
 0x1a5   : > { %v2292_v61 = vsub.f32 0.0, %v4188_v42  ;;  %v4198_v62 = vadd.f32 %v4185_v1, %v2147_v14  ;;  %v2831_v63 = vpop.f32.mrb[2].mxu0  ;;  %v4201_v3 = vadd.f32 %v2847_v48, %v4185_v1  ;;  %v2214_v6 = vpop.f32.mrb[3].mxu1 }
 0x1a6   : > { %v2276_v7 = vsub.f32 0.0, %v4191_v60  ;;  %v2290_v8 = vsub.f32 0.0, %v4194_v55  ;;  %v4206_v16 = vadd.f32 %v2831_v63, %v4185_v1  ;;  %v2150_v18 = vpop.f32.mrb[3].mxu0  ;;  %v4209_v2 = vadd.f32 %v4185_v1, %v2214_v6 }
 0x1a7   : > { %v2342_v4 = vmul.f32 1.442695, %v2292_v61  ;;  %v2274_v9 = vsub.f32 0.0, %v4198_v62  ;;  %v2293_v59 = vsub.f32 0.0, %v4201_v3  ;;  %v4214_v19 = vadd.f32 %v4185_v1, %v2150_v18 }
 0x1a8   : > { %v2310_v20 = vmul.f32 1.442695, %v2276_v7  ;;  %v2338_v23 = vmul.f32 1.442695, %v2290_v8  ;;  %v2277_v24 = vsub.f32 0.0, %v4206_v16  ;;  %v2291_v25 = vsub.f32 0.0, %v4209_v2 }
 0x1a9   : > { %3014 = vpow2.f32 %v2342_v4  ;;  %v2306_v26 = vmul.f32 1.442695, %v2274_v9  ;;  %v2275_v27 = vsub.f32 0.0, %v4214_v19  ;;  %v2344_v31 = vmul.f32 1.442695, %v2293_v59 }
 0x1aa   : > { %3016 = vpow2.f32 %v2310_v20  ;;  %v2312_v29 = vmul.f32 1.442695, %v2277_v24  ;;  %v2340_v0 = vmul.f32 1.442695, %v2291_v25 }
 0x1ab   : > { %3018 = vpow2.f32 %v2306_v26  ;;  %v2308_v32 = vmul.f32 1.442695, %v2275_v27 }
 0x1ac   : > { %3020 = vpow2.f32 %v2338_v23 }
 0x1ad   : > { %3022 = vpow2.f32 %v2312_v29 }
 0x1ae   : > { %3024 = vpow2.f32 %v2344_v31 }
 0x1af   : > { %3026 = vpow2.f32 %v2308_v32 }
 0x1b0   : > { %3028 = vpow2.f32 %v2340_v0 }
 0x1b3   : > { %v3015_v15 = vpop.eup %3014 }
 0x1b4   : > { %v3017_v11 = vpop.eup %3016  ;;  %v2388_v10 = vadd.f32 1.0, %v3015_v15 }
 0x1b5   : > { %v3019_v21 = vpop.eup %3018  ;;  %v2372_v33 = vadd.f32 1.0, %v3017_v11 }
 0x1b6   : > { %v3021_v17 = vpop.eup %3020  ;;  %3030 = vrcp.f32 %v2388_v10  ;;  %v2370_v34 = vadd.f32 1.0, %v3019_v21 }
 0x1b7   : > { %v3023_v5 = vpop.eup %3022  ;;  %3032 = vrcp.f32 %v2372_v33  ;;  %v2386_v54 = vadd.f32 1.0, %v3021_v17 }
 0x1b8   : > { %v3025_v28 = vpop.eup %3024  ;;  %3034 = vrcp.f32 %v2370_v34  ;;  %v2373_v35 = vadd.f32 1.0, %v3023_v5 }
 0x1b9   : > { %v3027_v37 = vpop.eup %3026  ;;  %3036 = vrcp.f32 %v2386_v54  ;;  %v2389_v36 = vadd.f32 1.0, %v3025_v28 }
 0x1ba   : > { %v3029_v41 = vpop.eup %3028  ;;  %3038 = vrcp.f32 %v2373_v35  ;;  %v2371_v44 = vadd.f32 1.0, %v3027_v37 }
 0x1bb   : > { %3040 = vrcp.f32 %v2389_v36  ;;  %v2387_v45 = vadd.f32 1.0, %v3029_v41 }
 0x1bc   : > { %3042 = vrcp.f32 %v2371_v44 }
 0x1bd   : > { %3044 = vrcp.f32 %v2387_v45 }
 0x1c0   : > { %v3031_v47 = vpop.eup %3030 }
 0x1c1   : > { %v3033_v50 = vpop.eup %3032  ;;  %v2452_v51 = vmul.f32 %v3031_v47, %v4188_v42 }
 0x1c2   : > { %v3035_v52 = vpop.eup %3034  ;;  %v2436_v38 = vmul.f32 %v3033_v50, %v4191_v60 }
 0x1c3   : > { %v3037_v40 = vpop.eup %3036  ;;  %2485 = vst.msk [vmem:[%s4223_s25 + $0x90] sm:$0xff] %vm2466_vm12, %v2452_v51  ;;  %v2434_v22 = vmul.f32 %v3035_v52, %v4198_v62 }
 0x1c4   : > { %v3039_v39 = vpop.eup %3038  ;;  %2469 = vst.msk [vmem:[%s4223_s25 + $0x10] sm:$0xff] %vm2466_vm12, %v2436_v38  ;;  %v2450_v30 = vmul.f32 %v3037_v40, %v4194_v55 }
 0x1c5   : > { %v3041_v49 = vpop.eup %3040  ;;  %2467 = vst.msk [vmem:[%s4223_s25] sm:$0xff] %vm2466_vm12, %v2434_v22  ;;  %v2437_v53 = vmul.f32 %v3039_v39, %v4206_v16 }
 0x1c6   : > { %v3043_v12 = vpop.eup %3042  ;;  %2483 = vst.msk [vmem:[%s4223_s25 + $0x80] sm:$0xff] %vm2466_vm12, %v2450_v30  ;;  %v2453_v13 = vmul.f32 %v3041_v49, %v4201_v3 }
 0x1c7   : > { %v3045_v43 = vpop.eup %3044  ;;  %2470 = vst.msk [vmem:[%s4223_s25 + $0x18] sm:$0xff] %vm2466_vm12, %v2437_v53  ;;  %v2435_v56 = vmul.f32 %v3043_v12, %v4214_v19 }
 0x1c8   : > { %2486 = vst.msk [vmem:[%s4223_s25 + $0x98] sm:$0xff] %vm2466_vm12, %v2453_v13  ;;  %v2451_v57 = vmul.f32 %v3045_v43, %v4209_v2 }
 0x1c9   : > { %2468 = vst.msk [vmem:[%s4223_s25 + $0x8] sm:$0xff] %vm2466_vm12, %v2435_v56 }
 0x1ca   : > { %2484 = vst.msk [vmem:[%s4223_s25 + $0x88] sm:$0xff] %vm2466_vm12, %v2451_v57 }
 0x1e2   : > { %v2850_v58 = vpop.f32.mrb[4].mxu1 }
 0x1e3   : > { %v2834_v42 = vpop.f32.mrb[4].mxu0  ;;  %v4250_v46 = vadd.f32 %v2850_v58, %v4185_v1  ;;  %v2227_v60 = vpop.f32.mrb[5].mxu1 }
 0x1e4   : > { %v4253_v14 = vadd.f32 %v2834_v42, %v4185_v1  ;;  %v2163_v55 = vpop.f32.mrb[5].mxu0  ;;  %v4256_v48 = vadd.f32 %v4185_v1, %v2227_v60  ;;  %v2851_v61 = vpop.f32.mrb[6].mxu1 }
 0x1e5   : > { %v2296_v62 = vsub.f32 0.0, %v4250_v46  ;;  %v2164_v63 = vadd.f32 %v4185_v1, %v2163_v55  ;;  %v2835_v3 = vpop.f32.mrb[6].mxu0  ;;  %v4261_v6 = vadd.f32 %v2851_v61, %v4185_v1  ;;  %v2230_v7 = vpop.f32.mrb[7].mxu1 }
 0x1e6   : > { %v2280_v8 = vsub.f32 0.0, %v4253_v14  ;;  %v2294_v16 = vsub.f32 0.0, %v4256_v48  ;;  %v2175_v18 = vadd.f32 %v2835_v3, %v4185_v1  ;;  %v2166_v2 = vpop.f32.mrb[7].mxu0  ;;  %v4267_v4 = vadd.f32 %v4185_v1, %v2230_v7 }
 0x1e7   : > { %v2350_v9 = vmul.f32 1.442695, %v2296_v62  ;;  %v2278_v59 = vsub.f32 0.0, %v2164_v63  ;;  %v2297_v19 = vsub.f32 0.0, %v4261_v6  ;;  %v2167_v20 = vadd.f32 %v4185_v1, %v2166_v2 }
 0x1e8   : > { %v2318_v23 = vmul.f32 1.442695, %v2280_v8  ;;  %v2346_v24 = vmul.f32 1.442695, %v2294_v16  ;;  %v2281_v25 = vsub.f32 0.0, %v2175_v18  ;;  %v2295_v26 = vsub.f32 0.0, %v4267_v4 }
 0x1e9   : > { %3046 = vpow2.f32 %v2350_v9  ;;  %v2314_v27 = vmul.f32 1.442695, %v2278_v59  ;;  %v2279_v29 = vsub.f32 0.0, %v2167_v20  ;;  %v2352_v32 = vmul.f32 1.442695, %v2297_v19 }
 0x1ea   : > { %3048 = vpow2.f32 %v2318_v23  ;;  %v2320_v31 = vmul.f32 1.442695, %v2281_v25  ;;  %v2348_v15 = vmul.f32 1.442695, %v2295_v26 }
 0x1eb   : > { %3050 = vpow2.f32 %v2314_v27  ;;  %v2316_v0 = vmul.f32 1.442695, %v2279_v29 }
 0x1ec   : > { %3052 = vpow2.f32 %v2346_v24 }
 0x1ed   : > { %3054 = vpow2.f32 %v2320_v31 }
 0x1ee   : > { %3056 = vpow2.f32 %v2352_v32 }
 0x1ef   : > { %3058 = vpow2.f32 %v2316_v0 }
 0x1f0   : > { %3060 = vpow2.f32 %v2348_v15 }
 0x1f3   : > { %v3047_v11 = vpop.eup %3046 }
 0x1f4   : > { %v3049_v10 = vpop.eup %3048  ;;  %v2392_v21 = vadd.f32 1.0, %v3047_v11 }
 0x1f5   : > { %v3051_v33 = vpop.eup %3050  ;;  %v2376_v17 = vadd.f32 1.0, %v3049_v10 }
 0x1f6   : > { %v3053_v34 = vpop.eup %3052  ;;  %3062 = vrcp.f32 %v2392_v21  ;;  %v2374_v5 = vadd.f32 1.0, %v3051_v33 }
 0x1f7   : > { %v3055_v54 = vpop.eup %3054  ;;  %3064 = vrcp.f32 %v2376_v17  ;;  %v2390_v28 = vadd.f32 1.0, %v3053_v34 }
 0x1f8   : > { %v3057_v35 = vpop.eup %3056  ;;  %3066 = vrcp.f32 %v2374_v5  ;;  %v2377_v37 = vadd.f32 1.0, %v3055_v54 }
 0x1f9   : > { %v3059_v36 = vpop.eup %3058  ;;  %3068 = vrcp.f32 %v2390_v28  ;;  %v2393_v41 = vadd.f32 1.0, %v3057_v35 }
 0x1fa   : > { %v3061_v44 = vpop.eup %3060  ;;  %3070 = vrcp.f32 %v2377_v37  ;;  %v2375_v45 = vadd.f32 1.0, %v3059_v36 }
 0x1fb   : > { %3072 = vrcp.f32 %v2393_v41  ;;  %v2391_v47 = vadd.f32 1.0, %v3061_v44 }
 0x1fc   : > { %3074 = vrcp.f32 %v2375_v45 }
 0x1fd   : > { %3076 = vrcp.f32 %v2391_v47 }
 0x200   : > { %v3063_v50 = vpop.eup %3062 }
 0x201   : > { %v3065_v51 = vpop.eup %3064  ;;  %v2456_v52 = vmul.f32 %v3063_v50, %v4250_v46 }
 0x202   : > { %v3067_v38 = vpop.eup %3066  ;;  %v2440_v40 = vmul.f32 %v3065_v51, %v4253_v14 }
 0x203   : > { %v3069_v22 = vpop.eup %3068  ;;  %2489 = vst.msk [vmem:[%s4223_s25 + $0xb0] sm:$0xff] %vm2466_vm12, %v2456_v52  ;;  %v2438_v39 = vmul.f32 %v3067_v38, %v2164_v63 }
 0x204   : > { %v3071_v30 = vpop.eup %3070  ;;  %2473 = vst.msk [vmem:[%s4223_s25 + $0x30] sm:$0xff] %vm2466_vm12, %v2440_v40  ;;  %v2454_v49 = vmul.f32 %v3069_v22, %v4256_v48 }
 0x205   : > { %v3073_v53 = vpop.eup %3072  ;;  %2471 = vst.msk [vmem:[%s4223_s25 + $0x20] sm:$0xff] %vm2466_vm12, %v2438_v39  ;;  %v2441_v12 = vmul.f32 %v3071_v30, %v2175_v18 }
 0x206   : > { %v3075_v13 = vpop.eup %3074  ;;  %2487 = vst.msk [vmem:[%s4223_s25 + $0xa0] sm:$0xff] %vm2466_vm12, %v2454_v49  ;;  %v2457_v43 = vmul.f32 %v3073_v53, %v4261_v6 }
 0x207   : > { %v3077_v56 = vpop.eup %3076  ;;  %2474 = vst.msk [vmem:[%s4223_s25 + $0x38] sm:$0xff] %vm2466_vm12, %v2441_v12  ;;  %v2439_v57 = vmul.f32 %v3075_v13, %v2167_v20 }
 0x208   : > { %2490 = vst.msk [vmem:[%s4223_s25 + $0xb8] sm:$0xff] %vm2466_vm12, %v2457_v43  ;;  %v2455_v58 = vmul.f32 %v3077_v56, %v4267_v4 }
 0x209   : > { %2472 = vst.msk [vmem:[%s4223_s25 + $0x28] sm:$0xff] %vm2466_vm12, %v2439_v57 }
 0x20a   : > { %2488 = vst.msk [vmem:[%s4223_s25 + $0xa8] sm:$0xff] %vm2466_vm12, %v2455_v58 }
 0x222   : > { %v2854_v42 = vpop.f32.mrb[8].mxu1 }
 0x223   : > { %v2838_v46 = vpop.f32.mrb[8].mxu0  ;;  %v4294_v60 = vadd.f32 %v2854_v42, %v4185_v1  ;;  %v2243_v14 = vpop.f32.mrb[9].mxu1 }
 0x224   : > { %v4297_v55 = vadd.f32 %v2838_v46, %v4185_v1  ;;  %v2179_v48 = vpop.f32.mrb[9].mxu0  ;;  %v4300_v61 = vadd.f32 %v4185_v1, %v2243_v14  ;;  %v2855_v62 = vpop.f32.mrb[10].mxu1 }
 0x225   : > { %v2300_v63 = vsub.f32 0.0, %v4294_v60  ;;  %v2180_v3 = vadd.f32 %v4185_v1, %v2179_v48  ;;  %v2839_v6 = vpop.f32.mrb[10].mxu0  ;;  %v4305_v7 = vadd.f32 %v2855_v62, %v4185_v1  ;;  %v2246_v8 = vpop.f32.mrb[11].mxu1 }
 0x226   : > { %v2284_v16 = vsub.f32 0.0, %v4297_v55  ;;  %v2298_v18 = vsub.f32 0.0, %v4300_v61  ;;  %v2191_v2 = vadd.f32 %v2839_v6, %v4185_v1  ;;  %v2182_v4 = vpop.f32.mrb[11].mxu0  ;;  %v4311_v9 = vadd.f32 %v4185_v1, %v2246_v8 }
 0x227   : > { %v2358_v59 = vmul.f32 1.442695, %v2300_v63  ;;  %v2282_v19 = vsub.f32 0.0, %v2180_v3  ;;  %v2301_v20 = vsub.f32 0.0, %v4305_v7  ;;  %v2183_v23 = vadd.f32 %v4185_v1, %v2182_v4 }
 0x228   : > { %v2326_v24 = vmul.f32 1.442695, %v2284_v16  ;;  %v2354_v25 = vmul.f32 1.442695, %v2298_v18  ;;  %v2285_v26 = vsub.f32 0.0, %v2191_v2  ;;  %v2299_v27 = vsub.f32 0.0, %v4311_v9 }
 0x229   : > { %3078 = vpow2.f32 %v2358_v59  ;;  %v2322_v29 = vmul.f32 1.442695, %v2282_v19  ;;  %v2283_v31 = vsub.f32 0.0, %v2183_v23  ;;  %v2360_v0 = vmul.f32 1.442695, %v2301_v20 }
 0x22a   : > { %3080 = vpow2.f32 %v2326_v24  ;;  %v2328_v32 = vmul.f32 1.442695, %v2285_v26  ;;  %v2356_v11 = vmul.f32 1.442695, %v2299_v27 }
 0x22b   : > { %3082 = vpow2.f32 %v2322_v29  ;;  %v2324_v15 = vmul.f32 1.442695, %v2283_v31 }
 0x22c   : > { %3084 = vpow2.f32 %v2354_v25 }
 0x22d   : > { %3086 = vpow2.f32 %v2328_v32 }
 0x22e   : > { %3088 = vpow2.f32 %v2360_v0 }
 0x22f   : > { %3090 = vpow2.f32 %v2324_v15 }
 0x230   : > { %3092 = vpow2.f32 %v2356_v11 }
 0x233   : > { %v3079_v10 = vpop.eup %3078 }
 0x234   : > { %v3081_v21 = vpop.eup %3080  ;;  %v2396_v33 = vadd.f32 1.0, %v3079_v10 }
 0x235   : > { %v3083_v17 = vpop.eup %3082  ;;  %v2380_v34 = vadd.f32 1.0, %v3081_v21 }
 0x236   : > { %v3085_v5 = vpop.eup %3084  ;;  %3094 = vrcp.f32 %v2396_v33  ;;  %v2378_v54 = vadd.f32 1.0, %v3083_v17 }
 0x237   : > { %v3087_v28 = vpop.eup %3086  ;;  %3096 = vrcp.f32 %v2380_v34  ;;  %v2394_v35 = vadd.f32 1.0, %v3085_v5 }
 0x238   : > { %v3089_v37 = vpop.eup %3088  ;;  %3098 = vrcp.f32 %v2378_v54  ;;  %v2381_v36 = vadd.f32 1.0, %v3087_v28 }
 0x239   : > { %v3091_v41 = vpop.eup %3090  ;;  %3100 = vrcp.f32 %v2394_v35  ;;  %v2397_v44 = vadd.f32 1.0, %v3089_v37 }
 0x23a   : > { %v3093_v45 = vpop.eup %3092  ;;  %3102 = vrcp.f32 %v2381_v36  ;;  %v2379_v47 = vadd.f32 1.0, %v3091_v41 }
 0x23b   : > { %3104 = vrcp.f32 %v2397_v44  ;;  %v2395_v50 = vadd.f32 1.0, %v3093_v45 }
 0x23c   : > { %3106 = vrcp.f32 %v2379_v47 }
 0x23d   : > { %3108 = vrcp.f32 %v2395_v50 }
 0x240   : > { %v3095_v51 = vpop.eup %3094 }
 0x241   : > { %v3097_v52 = vpop.eup %3096  ;;  %v2460_v38 = vmul.f32 %v3095_v51, %v4294_v60 }
 0x242   : > { %v3099_v40 = vpop.eup %3098  ;;  %v2444_v22 = vmul.f32 %v3097_v52, %v4297_v55 }
 0x243   : > { %v3101_v39 = vpop.eup %3100  ;;  %2493 = vst.msk [vmem:[%s4223_s25 + $0xd0] sm:$0xff] %vm2466_vm12, %v2460_v38  ;;  %v2442_v30 = vmul.f32 %v3099_v40, %v2180_v3 }
 0x244   : > { %v3103_v49 = vpop.eup %3102  ;;  %2477 = vst.msk [vmem:[%s4223_s25 + $0x50] sm:$0xff] %vm2466_vm12, %v2444_v22  ;;  %v2458_v53 = vmul.f32 %v3101_v39, %v4300_v61 }
 0x245   : > { %v3105_v12 = vpop.eup %3104  ;;  %2475 = vst.msk [vmem:[%s4223_s25 + $0x40] sm:$0xff] %vm2466_vm12, %v2442_v30  ;;  %v2445_v13 = vmul.f32 %v3103_v49, %v2191_v2 }
 0x246   : > { %v3107_v43 = vpop.eup %3106  ;;  %2491 = vst.msk [vmem:[%s4223_s25 + $0xc0] sm:$0xff] %vm2466_vm12, %v2458_v53  ;;  %v2461_v56 = vmul.f32 %v3105_v12, %v4305_v7 }
 0x247   : > { %v3109_v57 = vpop.eup %3108  ;;  %2478 = vst.msk [vmem:[%s4223_s25 + $0x58] sm:$0xff] %vm2466_vm12, %v2445_v13  ;;  %v2443_v58 = vmul.f32 %v3107_v43, %v2183_v23 }
 0x248   : > { %2494 = vst.msk [vmem:[%s4223_s25 + $0xd8] sm:$0xff] %vm2466_vm12, %v2461_v56  ;;  %v2459_v42 = vmul.f32 %v3109_v57, %v4311_v9 }
 0x249   : > { %2476 = vst.msk [vmem:[%s4223_s25 + $0x48] sm:$0xff] %vm2466_vm12, %v2443_v58 }
 0x24a   : > { %2492 = vst.msk [vmem:[%s4223_s25 + $0xc8] sm:$0xff] %vm2466_vm12, %v2459_v42 }
 0x25e   : > { %v2858_v46 = vpop.f32.mrb[12].mxu1 }
 0x25f   : > { %v2842_v60 = vpop.f32.mrb[12].mxu0  ;;  %v4338_v14 = vadd.f32 %v2858_v46, %v4185_v1  ;;  %v2259_v55 = vpop.f32.mrb[13].mxu1 }
 0x260   : > { %v4341_v48 = vadd.f32 %v2842_v60, %v4185_v1  ;;  %v2195_v61 = vpop.f32.mrb[13].mxu0  ;;  %v4344_v62 = vadd.f32 %v4185_v1, %v2259_v55  ;;  %v2859_v63 = vpop.f32.mrb[14].mxu1 }
 0x261   : > { %v2304_v3 = vsub.f32 0.0, %v4338_v14  ;;  %v2196_v6 = vadd.f32 %v4185_v1, %v2195_v61  ;;  %v2843_v7 = vpop.f32.mrb[14].mxu0  ;;  %v4349_v8 = vadd.f32 %v2859_v63, %v4185_v1  ;;  %v2262_v16 = vpop.f32.mrb[15].mxu1 }
 0x262   : > { %v2288_v18 = vsub.f32 0.0, %v4341_v48  ;;  %v2302_v2 = vsub.f32 0.0, %v4344_v62  ;;  %v2207_v4 = vadd.f32 %v2843_v7, %v4185_v1  ;;  %v2198_v9 = vpop.f32.mrb[15].mxu0  ;;  %v4355_v59 = vadd.f32 %v4185_v1, %v2262_v16 }
 0x263   : > { %v2366_v19 = vmul.f32 1.442695, %v2304_v3  ;;  %v2286_v20 = vsub.f32 0.0, %v2196_v6  ;;  %v2305_v23 = vsub.f32 0.0, %v4349_v8  ;;  %v2199_v24 = vadd.f32 %v4185_v1, %v2198_v9 }
 0x264   : > { %v2334_v25 = vmul.f32 1.442695, %v2288_v18  ;;  %v2362_v26 = vmul.f32 1.442695, %v2302_v2  ;;  %v2289_v27 = vsub.f32 0.0, %v2207_v4  ;;  %v2303_v29 = vsub.f32 0.0, %v4355_v59 }
 0x265   : > { %3110 = vpow2.f32 %v2366_v19  ;;  %v2330_v31 = vmul.f32 1.442695, %v2286_v20  ;;  %v2287_v32 = vsub.f32 0.0, %v2199_v24  ;;  %v2368_v15 = vmul.f32 1.442695, %v2305_v23 }
 0x266   : > { %3112 = vpow2.f32 %v2334_v25  ;;  %v2336_v0 = vmul.f32 1.442695, %v2289_v27  ;;  %v2364_v10 = vmul.f32 1.442695, %v2303_v29 }
 0x267   : > { %3114 = vpow2.f32 %v2330_v31  ;;  %v2332_v11 = vmul.f32 1.442695, %v2287_v32 }
 0x268   : > { %3116 = vpow2.f32 %v2362_v26 }
 0x269   : > { %3118 = vpow2.f32 %v2336_v0 }
 0x26a   : > { %3120 = vpow2.f32 %v2368_v15 }
 0x26b   : > { %3122 = vpow2.f32 %v2332_v11 }
 0x26c   : > { %3124 = vpow2.f32 %v2364_v10 }
 0x26f   : > { %v3111_v1 = vpop.eup %3110 }
 0x270   : > { %v3113_v21 = vpop.eup %3112  ;;  %v2400_v33 = vadd.f32 1.0, %v3111_v1 }
 0x271   : > { %v3115_v17 = vpop.eup %3114  ;;  %v2384_v34 = vadd.f32 1.0, %v3113_v21 }
 0x272   : > { %v3117_v5 = vpop.eup %3116  ;;  %3126 = vrcp.f32 %v2400_v33  ;;  %v2382_v54 = vadd.f32 1.0, %v3115_v17 }
 0x273   : > { %v3119_v28 = vpop.eup %3118  ;;  %3128 = vrcp.f32 %v2384_v34  ;;  %v2398_v35 = vadd.f32 1.0, %v3117_v5 }
 0x274   : > { %v3121_v37 = vpop.eup %3120  ;;  %3130 = vrcp.f32 %v2382_v54  ;;  %v2385_v36 = vadd.f32 1.0, %v3119_v28 }
 0x275   : > { %v3123_v41 = vpop.eup %3122  ;;  %3132 = vrcp.f32 %v2398_v35  ;;  %v2401_v44 = vadd.f32 1.0, %v3121_v37 }
 0x276   : > { %v3125_v45 = vpop.eup %3124  ;;  %3134 = vrcp.f32 %v2385_v36  ;;  %v2383_v47 = vadd.f32 1.0, %v3123_v41 }
 0x277   : > { %3136 = vrcp.f32 %v2401_v44  ;;  %v2399_v50 = vadd.f32 1.0, %v3125_v45 }
 0x278   : > { %3138 = vrcp.f32 %v2383_v47 }
 0x279   : > { %3140 = vrcp.f32 %v2399_v50 }
 0x27c   : > { %v3127_v51 = vpop.eup %3126 }
 0x27d   : > { %v3129_v52 = vpop.eup %3128  ;;  %v2464_v38 = vmul.f32 %v3127_v51, %v4338_v14 }
 0x27e   : > { %v3131_v40 = vpop.eup %3130  ;;  %v2448_v22 = vmul.f32 %v3129_v52, %v4341_v48 }
 0x27f   : > { %v3133_v39 = vpop.eup %3132  ;;  %2497 = vst.msk [vmem:[%s4223_s25 + $0xf0] sm:$0xff] %vm2466_vm12, %v2464_v38  ;;  %v2446_v30 = vmul.f32 %v3131_v40, %v2196_v6 }
 0x280   : > { %v3135_v49 = vpop.eup %3134  ;;  %2481 = vst.msk [vmem:[%s4223_s25 + $0x70] sm:$0xff] %vm2466_vm12, %v2448_v22  ;;  %v2462_v53 = vmul.f32 %v3133_v39, %v4344_v62 }
 0x281   : > { %v3137_v12 = vpop.eup %3136  ;;  %2479 = vst.msk [vmem:[%s4223_s25 + $0x60] sm:$0xff] %vm2466_vm12, %v2446_v30  ;;  %v2449_v13 = vmul.f32 %v3135_v49, %v2207_v4 }
 0x282   : > { %v3139_v43 = vpop.eup %3138  ;;  %2495 = vst.msk [vmem:[%s4223_s25 + $0xe0] sm:$0xff] %vm2466_vm12, %v2462_v53  ;;  %v2465_v56 = vmul.f32 %v3137_v12, %v4349_v8 }
 0x283   : > { %v3141_v57 = vpop.eup %3140  ;;  %2482 = vst.msk [vmem:[%s4223_s25 + $0x78] sm:$0xff] %vm2466_vm12, %v2449_v13  ;;  %v2447_v58 = vmul.f32 %v3139_v43, %v2199_v24 }
 0x284   : > { %2498 = vst.msk [vmem:[%s4223_s25 + $0xf8] sm:$0xff] %vm2466_vm12, %v2465_v56  ;;  %v2463_v42 = vmul.f32 %v3141_v57, %v4355_v59 }
 0x285   : > { %2480 = vst.msk [vmem:[%s4223_s25 + $0x68] sm:$0xff] %vm2466_vm12, %v2447_v58 }
 0x286   : > { %2496 = vst.msk [vmem:[%s4223_s25 + $0xe8] sm:$0xff] %vm2466_vm12, %v2463_v42 }
 0x287 PF: > { %s13_s14 = sadd.s32 1, %s3164_s14   ;;  %s4394_s12 = smov %s3160_s13 }
 0x288   : > { %p10_p6 = scmp.ge.s32.totalorder %s13_s14, 4   ;;  %s4395_s13 = smov %s4397_s15 }
 0x28a   :  { %12 = sbr.rel (!%p10_p6) target bundleno = 2 (0x2), region = 69 }

</bundles_post_ra>
